<compile_context>
chip_gen: v7x
topology: tpu7x:2x2x1
jax: 0.10.0
libtpu: 0.0.40
codegen_flags: <defaults>
</compile_context>

<pallas_src>
import functools
import math

import jax
import jax.numpy as jnp
from jax.experimental import pallas as pl
from jax.experimental.pallas import tpu as pltpu


# ----------------------------- helpers ------------------------------

_VMEM_LIMIT = 48 * 1024 * 1024   # scoped-VMEM budget; safe on v5e/v6e (128 MiB) and v7x (64 MiB)


def _round_up(x, m):
    return (x + m - 1) // m * m


def _row_tiling(m, max_tile=512):
    """Row tile (sublane aligned, <=512 rows) and padded row count, preferring >=2 grid steps."""
    n = max(2, -(-m // max_tile))          # at least 2 steps so both v7x TensorCores get work
    tm = _round_up(-(-m // n), 8)
    return tm, _round_up(m, tm)


def _pick_bt(batch, seq, dim, itemsize=4, target_bytes=2 << 20):
    """Batch-elements per grid step for the LN/QKV/MLP kernels (~2 MB tiles, >=2 grid steps)."""
    bt = max(1, min(batch, target_bytes // max(1, seq * dim * itemsize)))
    if batch >= 2:
        bt = max(1, min(bt, batch // 2))   # keep >=2 grid steps (v7x: 2 TensorCores)
    while batch % bt:
        bt -= 1
    return bt


def _pad_rows(x, mp):
    m = x.shape[0]
    if mp == m:
        return x
    return jnp.pad(x, ((0, mp - m), (0, 0)))


def _cparams(n_parallel, vmem_bytes=None):
    return pltpu.CompilerParams(dimension_semantics=("parallel",) * n_parallel,
                                vmem_limit_bytes=vmem_bytes)


def _layernorm_f32(x, g, b, eps):
    mu = jnp.mean(x, axis=-1, keepdims=True)
    var = jnp.mean(jnp.square(x - mu), axis=-1, keepdims=True)
    return (x - mu) * jax.lax.rsqrt(var + eps) * g + b


# ----------------------------- Pallas kernels ------------------------------

def _conv_relu_kernel(x_ref, w_ref, o_ref):
    # im2col patch rows @ conv weight, ReLU, no bias (Conv2d has bias=False); bf16 output.
    y = jnp.dot(x_ref[...].astype(jnp.bfloat16), w_ref[...],
                preferred_element_type=jnp.float32)
    o_ref[...] = jnp.maximum(y, 0.0).astype(o_ref.dtype)


def _maxpool_pos_kernel(x_ref, pos_ref, o_ref, *, kk):
    # x: (1, KK, S, D) bf16 pooling windows.  Unrolled elementwise max chain (VPU, no XLU reduce),
    # then upcast + absolute positional-embedding add (fused).
    m = x_ref[0, 0]
    for k in range(1, kk):                       # static unroll over the window slices
        m = jnp.maximum(m, x_ref[0, k])
    o_ref[0] = (m.astype(jnp.float32) + pos_ref[...]).astype(o_ref.dtype)


def _ln_qkv_kernel(x_ref, g_ref, b_ref, w_ref, bias_ref, o_ref, *, eps):
    # Fused: LayerNorm + QKV projection.  Weight pre-padded so the output lane dim is a
    # multiple of 128 (lane-dense, unmasked stores).
    bt = x_ref.shape[0]
    for i in range(bt):                          # static unroll over batch elements in this tile
        y = _layernorm_f32(x_ref[i].astype(jnp.float32), g_ref[...], b_ref[...], eps)
        o = jnp.dot(y.astype(jnp.bfloat16), w_ref[...], preferred_element_type=jnp.float32)
        o_ref[i] = (o + bias_ref[...]).astype(o_ref.dtype)


def _attn_kernel(qkv_ref, wo_ref, bo_ref, res_ref, o_ref,
                 *, num_heads, head_dim, model_dim, scale):
    # Fused: all-heads attention + output projection + residual add, one batch element per step.
    # qkv: (1, S, 3D_pad) bf16 slab (heads split in-kernel); wo: (D, D) bf16; bo: (1, D);
    # res: (1, S, D) f32.
    qkv = qkv_ref[0]                                                        # (S, 3D_pad) bf16
    heads = []
    for h in range(num_heads):                                              # static unroll
        lo = h * head_dim
        q = qkv[:, lo:lo + head_dim]
        k = qkv[:, model_dim + lo:model_dim + lo + head_dim]
        v = qkv[:, 2 * model_dim + lo:2 * model_dim + lo + head_dim]
        # contract on the last axes (no explicit k.T / XLU transpose)
        s = jax.lax.dot_general(q, k, (((1,), (1,)), ((), ())),
                                preferred_element_type=jnp.float32) * scale
        m = jnp.max(s, axis=-1, keepdims=True)
        p = jnp.exp(s - m)
        p = p * pl.reciprocal(jnp.sum(p, axis=-1, keepdims=True), approx=True)
        heads.append(jnp.dot(p.astype(v.dtype), v, preferred_element_type=jnp.float32))
    # single O-projection over concatenated heads: (S, H*Dh) @ (H*Dh, D)
    attn_cat = jnp.concatenate(heads, axis=-1).astype(jnp.bfloat16)         # (S, D)
    out = jnp.dot(attn_cat, wo_ref[...], preferred_element_type=jnp.float32)
    o_ref[0] = (res_ref[0].astype(jnp.float32) + out + bo_ref[...]).astype(o_ref.dtype)


def _ln_mlp_kernel(x_ref, g_ref, b_ref, w1_ref, b1_ref, w2_ref, b2_ref, o_ref, *, eps):
    # Fused: LayerNorm + Linear + GELU + Linear + residual add.
    bt = x_ref.shape[0]
    for i in range(bt):                          # static unroll over batch elements in this tile
        x = x_ref[i].astype(jnp.float32)
        y = _layernorm_f32(x, g_ref[...], b_ref[...], eps)
        h = jnp.dot(y.astype(jnp.bfloat16), w1_ref[...], preferred_element_type=jnp.float32)
        # TODO(synk): PyTorch default nn.GELU is erf-based; tanh approximation used (EUP-friendly).
        h = jax.nn.gelu(h + b1_ref[...], approximate=True)
        o = jnp.dot(h.astype(jnp.bfloat16), w2_ref[...], preferred_element_type=jnp.float32)
        o_ref[i] = (x + o + b2_ref[...]).astype(o_ref.dtype)


def _head_kernel(x_ref, g_ref, b_ref, pw_ref, pb_ref, fw_ref, fb_ref, o_ref, *, eps):
    # Fused: final LayerNorm + gate logits + softmax over sequence + weighted sum + classifier.
    y = _layernorm_f32(x_ref[0].astype(jnp.float32), g_ref[...], b_ref[...], eps)      # (S, D)
    logits = jax.lax.dot_general(pw_ref[...], y, (((1,), (1,)), ((), ())),
                                 preferred_element_type=jnp.float32) + pb_ref[...]     # (1, S)
    m = jnp.max(logits, axis=-1, keepdims=True)
    p = jnp.exp(logits - m)
    gate = p * pl.reciprocal(jnp.sum(p, axis=-1, keepdims=True), approx=True)          # (1, S)
    aggr = jnp.dot(gate, y, preferred_element_type=jnp.float32)                        # (1, D)
    out = jnp.dot(aggr.astype(jnp.bfloat16), fw_ref[...],
                  preferred_element_type=jnp.float32) + fb_ref[...]                    # (1, Cpad)
    o_ref[0] = out.astype(o_ref.dtype)


# ----------------------------- kernel wrappers ------------------------------

def conv_relu(patches, w_bf16):
    M, K = patches.shape
    N = w_bf16.shape[1]
    tm, mp = _row_tiling(M)
    xp = _pad_rows(patches, mp)
    out = pl.pallas_call(
        _conv_relu_kernel,
        out_shape=jax.ShapeDtypeStruct((mp, N), jnp.bfloat16),
        grid=(mp // tm,),
        in_specs=[pl.BlockSpec((tm, K), lambda i: (i, 0)),
                  pl.BlockSpec((K, N), lambda i: (0, 0))],
        out_specs=pl.BlockSpec((tm, N), lambda i: (i, 0)),
        compiler_params=_cparams(1, _VMEM_LIMIT),
    )(xp, w_bf16)
    return out[:M]


def maxpool_posadd(windows, pos):
    B, KK, S, D = windows.shape
    kern = functools.partial(_maxpool_pos_kernel, kk=KK)
    return pl.pallas_call(
        kern,
        out_shape=jax.ShapeDtypeStruct((B, S, D), jnp.float32),
        grid=(B,),
        in_specs=[pl.BlockSpec((1, KK, S, D), lambda b: (b, 0, 0, 0)),
                  pl.BlockSpec((S, D), lambda b: (0, 0))],
        out_specs=pl.BlockSpec((1, S, D), lambda b: (b, 0, 0)),
        compiler_params=_cparams(1),
    )(windows, pos)


def ln_qkv(x, g, b, w, bias, *, bt, eps=1e-5):
    B, S, D = x.shape
    N3p = w.shape[1]
    kern = functools.partial(_ln_qkv_kernel, eps=eps)
    return pl.pallas_call(
        kern,
        out_shape=jax.ShapeDtypeStruct((B, S, N3p), jnp.bfloat16),
        grid=(B // bt,),
        in_specs=[pl.BlockSpec((bt, S, D), lambda i: (i, 0, 0)),
                  pl.BlockSpec((1, D), lambda i: (0, 0)),
                  pl.BlockSpec((1, D), lambda i: (0, 0)),
                  pl.BlockSpec((D, N3p), lambda i: (0, 0)),
                  pl.BlockSpec((1, N3p), lambda i: (0, 0))],
        out_specs=pl.BlockSpec((bt, S, N3p), lambda i: (i, 0, 0)),
        compiler_params=_cparams(1, _VMEM_LIMIT),
    )(x, g, b, w, bias)


def attn_oproj_residual(qkv, res, wo, bo, *, num_heads, dim):
    # TODO(synk): for very long sequences on v7x (64 MiB VMEM) add a KV-chunk grid axis
    # ("arbitrary") with an online-softmax accumulator instead of loading all of K/V per step.
    B, S, N3p = qkv.shape
    head_dim = dim // num_heads
    kern = functools.partial(_attn_kernel, num_heads=num_heads, head_dim=head_dim,
                             model_dim=dim, scale=1.0 / math.sqrt(head_dim))
    return pl.pallas_call(
        kern,
        out_shape=jax.ShapeDtypeStruct((B, S, dim), jnp.float32),
        grid=(B,),
        in_specs=[pl.BlockSpec((1, S, N3p), lambda b: (b, 0, 0)),
                  pl.BlockSpec((dim, dim), lambda b: (0, 0)),
                  pl.BlockSpec((1, dim), lambda b: (0, 0)),
                  pl.BlockSpec((1, S, dim), lambda b: (b, 0, 0))],
        out_specs=pl.BlockSpec((1, S, dim), lambda b: (b, 0, 0)),
        compiler_params=_cparams(1, _VMEM_LIMIT),
    )(qkv, wo, bo, res)


def ln_mlp_residual(x, g, b, w1, b1, w2, b2, *, bt, eps=1e-5):
    B, S, D = x.shape
    Hd = w1.shape[1]
    kern = functools.partial(_ln_mlp_kernel, eps=eps)
    return pl.pallas_call(
        kern,
        out_shape=jax.ShapeDtypeStruct((B, S, D), jnp.float32),
        grid=(B // bt,),
        in_specs=[pl.BlockSpec((bt, S, D), lambda i: (i, 0, 0)),
                  pl.BlockSpec((1, D), lambda i: (0, 0)),
                  pl.BlockSpec((1, D), lambda i: (0, 0)),
                  pl.BlockSpec((D, Hd), lambda i: (0, 0)),
                  pl.BlockSpec((1, Hd), lambda i: (0, 0)),
                  pl.BlockSpec((Hd, D), lambda i: (0, 0)),
                  pl.BlockSpec((1, D), lambda i: (0, 0))],
        out_specs=pl.BlockSpec((bt, S, D), lambda i: (i, 0, 0)),
        compiler_params=_cparams(1, _VMEM_LIMIT),
    )(x, g, b, w1, b1, w2, b2)


def cct_head(x, g, b, pw, pb, fw, fb, *, eps=1e-5):
    B, S, D = x.shape
    Cp = fw.shape[-1]
    kern = functools.partial(_head_kernel, eps=eps)
    out = pl.pallas_call(
        kern,
        out_shape=jax.ShapeDtypeStruct((B, 1, Cp), jnp.float32),
        grid=(B,),
        in_specs=[pl.BlockSpec((1, S, D), lambda bi: (bi, 0, 0)),
                  pl.BlockSpec((1, D), lambda bi: (0, 0)),
                  pl.BlockSpec((1, D), lambda bi: (0, 0)),
                  pl.BlockSpec((1, D), lambda bi: (0, 0)),
                  pl.BlockSpec((1, 1), lambda bi: (0, 0)),
                  pl.BlockSpec((D, Cp), lambda bi: (0, 0)),
                  pl.BlockSpec((1, Cp), lambda bi: (0, 0))],
        out_specs=pl.BlockSpec((1, 1, Cp), lambda bi: (bi, 0, 0)),
        compiler_params=_cparams(1),
    )(x, g, b, pw, pb, fw, fb)
    return out[:, 0, :]


# ----------------------------- parameters ------------------------------

def init_params(key, *, dim, num_layers, num_heads, in_channels, kernel_size,
                num_classes, mlp_ratio, num_embeddings):
    kh, kw = kernel_size
    hidden = dim * mlp_ratio
    keys = jax.random.split(key, 8 + num_layers)

    def normal(k, shape, scale=0.02):
        return (scale * jax.random.normal(k, shape)).astype(jnp.float32)

    params = {
        # conv weight in im2col layout: rows ordered (dy, dx, in_channel)
        "conv_w": normal(keys[0], (kh * kw * in_channels, dim)),
        "pos_emb": normal(keys[1], (num_embeddings, dim)),
        "pool_w": normal(keys[2], (dim, 1)),
        "pool_b": jnp.zeros((1,), jnp.float32),
        "fc_w": normal(keys[3], (dim, num_classes)),
        "fc_b": jnp.zeros((num_classes,), jnp.float32),
        "ln_f_g": jnp.ones((dim,), jnp.float32),
        "ln_f_b": jnp.zeros((dim,), jnp.float32),
    }
    layers = []
    for l in range(num_layers):
        lk = jax.random.split(keys[8 + l], 4)
        layers.append(dict(
            ln1_g=jnp.ones((dim,), jnp.float32), ln1_b=jnp.zeros((dim,), jnp.float32),
            wqkv=normal(lk[0], (dim, 3 * dim)), bqkv=jnp.zeros((3 * dim,), jnp.float32),
            wo=normal(lk[1], (dim, dim)), bo=jnp.zeros((dim,), jnp.float32),
            ln2_g=jnp.ones((dim,), jnp.float32), ln2_b=jnp.zeros((dim,), jnp.float32),
            w1=normal(lk[2], (dim, hidden)), b1=jnp.zeros((hidden,), jnp.float32),
            w2=normal(lk[3], (hidden, dim)), b2=jnp.zeros((dim,), jnp.float32),
        ))
    params["layers"] = layers
    return params


def prepare_params(params, *, dim, num_classes):
    """One-time weight preparation: bf16 casts, lane-dense padding, bias reshapes.

    Done once (outside the jitted forward) so no per-forward cast/pad HBM traffic remains.
    """
    N3 = 3 * dim
    N3p = _round_up(N3, 128)           # lane-dense QKV output (unmasked vst)
    Cp = _round_up(num_classes, 128)   # lane-dense classifier output
    prep = {
        "conv_w": params["conv_w"].astype(jnp.bfloat16),
        "pos_emb": params["pos_emb"].astype(jnp.float32),
        "pool_w": params["pool_w"].reshape(1, dim).astype(jnp.float32),
        "pool_b": params["pool_b"].reshape(1, 1).astype(jnp.float32),
        "fc_w": jnp.pad(params["fc_w"], ((0, 0), (0, Cp - num_classes))).astype(jnp.bfloat16),
        "fc_b": jnp.pad(params["fc_b"], (0, Cp - num_classes)).reshape(1, Cp).astype(jnp.float32),
        "ln_f_g": params["ln_f_g"].reshape(1, dim),
        "ln_f_b": params["ln_f_b"].reshape(1, dim),
    }
    layers = []
    for lyr in params["layers"]:
        hidden = lyr["w1"].shape[1]
        layers.append(dict(
            ln1_g=lyr["ln1_g"].reshape(1, dim), ln1_b=lyr["ln1_b"].reshape(1, dim),
            wqkv=jnp.pad(lyr["wqkv"], ((0, 0), (0, N3p - N3))).astype(jnp.bfloat16),
            bqkv=jnp.pad(lyr["bqkv"], (0, N3p - N3)).reshape(1, N3p).astype(jnp.float32),
            wo=lyr["wo"].astype(jnp.bfloat16), bo=lyr["bo"].reshape(1, dim),
            ln2_g=lyr["ln2_g"].reshape(1, dim), ln2_b=lyr["ln2_b"].reshape(1, dim),
            w1=lyr["w1"].astype(jnp.bfloat16), b1=lyr["b1"].reshape(1, hidden),
            w2=lyr["w2"].astype(jnp.bfloat16), b2=lyr["b2"].reshape(1, dim),
        ))
    prep["layers"] = layers
    return prep


# ----------------------------- forward pass ------------------------------

def absolute_cct_forward(prepared, pixel_values, *, dim, num_heads, kernel_size, num_classes):
    B, C, H, W = pixel_values.shape
    kh, kw = kernel_size

    # -- patch_embed: Conv2d(bias=False) + ReLU (Pallas matmul, bf16 out), MaxPool2d + pos-emb --
    x = jnp.transpose(pixel_values, (0, 2, 3, 1))                      # NCHW -> NHWC (glue)
    Ho, Wo = H - kh + 1, W - kw + 1
    # TODO(synk): im2col materializes kh*kw shifted copies in HBM; a gathering patch-embed
    # kernel would avoid it, but this stage is a small fraction of total traffic vs. the encoder.
    patches = [x[:, dy:dy + Ho, dx:dx + Wo, :] for dy in range(kh) for dx in range(kw)]
    patches = jnp.concatenate(patches, axis=-1).reshape(B * Ho * Wo, kh * kw * C)
    conv = conv_relu(patches, prepared["conv_w"]).reshape(B, Ho, Wo, dim)   # bf16

    # MaxPool2d(kernel_size), stride=kernel_size (floor mode) + absolute positional embedding.
    Hp, Wp = Ho // kh, Wo // kw
    S = Hp * Wp
    win = conv[:, :Hp * kh, :Wp * kw, :].reshape(B, Hp, kh, Wp, kw, dim)
    win = win.transpose(0, 2, 4, 1, 3, 5).reshape(B, kh * kw, S, dim)   # window axis leading
    x2 = maxpool_posadd(win, prepared["pos_emb"][:S])                   # (B, S, dim) f32

    # -- transformer encoder: 3 fused kernels/layer, (B, S, D) stream, zero per-layer XLA glue --
    bt = _pick_bt(B, S, dim)
    for layer in prepared["layers"]:
        qkv = ln_qkv(x2, layer["ln1_g"], layer["ln1_b"],
                     layer["wqkv"], layer["bqkv"], bt=bt)               # (B, S, 3D_pad) bf16
        x2 = attn_oproj_residual(qkv, x2, layer["wo"], layer["bo"],
                                 num_heads=num_heads, dim=dim)          # (B, S, dim) f32
        x2 = ln_mlp_residual(x2, layer["ln2_g"], layer["ln2_b"],
                             layer["w1"], layer["b1"], layer["w2"], layer["b2"], bt=bt)

    # -- head: final LN + gated softmax pooling + classifier (lane-dense, padded to 128) --
    out = cct_head(x2, prepared["ln_f_g"], prepared["ln_f_b"],
                   prepared["pool_w"], prepared["pool_b"],
                   prepared["fc_w"], prepared["fc_b"])                  # (B, Cpad)
    return out[:, :num_classes]


# ----------------------------- demo ------------------------------

if __name__ == "__main__":
    dim = 32
    num_layers = 2
    num_heads = 2
    in_channels = 4
    kernel_size = (3, 3)
    num_classes = 10
    mlp_ratio = 2
    num_embeddings = 64
    B, H, W = 2, 16, 16

    key = jax.random.PRNGKey(0)
    pkey, xkey = jax.random.split(key)
    raw_params = init_params(pkey, dim=dim, num_layers=num_layers, num_heads=num_heads,
                             in_channels=in_channels, kernel_size=kernel_size,
                             num_classes=num_classes, mlp_ratio=mlp_ratio,
                             num_embeddings=num_embeddings)
    prepared = prepare_params(raw_params, dim=dim, num_classes=num_classes)   # one-time prep
    pixel_values = jax.random.normal(xkey, (B, in_channels, H, W), dtype=jnp.float32)

    fwd = jax.jit(functools.partial(absolute_cct_forward, dim=dim, num_heads=num_heads,
                                    kernel_size=kernel_size, num_classes=num_classes))
    out = fwd(prepared, pixel_values)
    jax.block_until_ready(out)
    assert out.shape == (B, num_classes) and out.dtype == jnp.float32
    print("KERNEL_OK")
</pallas_src>

<mosaic_0001>
module attributes {stable_mosaic.version = 11 : i64} {
  func.func @_conv_relu_kernel(%arg0: i32, %arg1: memref<200x36xf32, #tpu.memory_space<vmem>>, %arg2: memref<36x32xbf16, #tpu.memory_space<vmem>>, %arg3: memref<200x32xbf16, #tpu.memory_space<vmem>>) attributes {dimension_semantics = [#tpu.dimension_semantics<parallel>], iteration_bounds = array<i64: 2>, scalar_prefetch = 0 : i64, scratch_operands = 0 : i64, tpu.core_type = #tpu.core_type<tc>, window_params = [{transform_indices = @transform_0, window_bounds = array<i64: 200, 36>}, {pipeline_mode = #tpu.pipeline_mode<synchronous>, transform_indices = @transform_1, window_bounds = array<i64: 36, 32>}, {transform_indices = @transform_2, window_bounds = array<i64: 200, 32>}]} {
    %c0 = arith.constant 0 : index
    %c0_0 = arith.constant 0 : index
    %0 = vector.load %arg1[%c0, %c0_0] : memref<200x36xf32, #tpu.memory_space<vmem>>, vector<200x36xf32>
    %1 = arith.truncf %0 : vector<200x36xf32> to vector<200x36xbf16>
    %c0_1 = arith.constant 0 : index
    %c0_2 = arith.constant 0 : index
    %2 = vector.load %arg2[%c0_1, %c0_2] : memref<36x32xbf16, #tpu.memory_space<vmem>>, vector<36x32xbf16>
    %cst = arith.constant dense<0.000000e+00> : vector<200x32xf32>
    %3 = tpu.matmul %1, %2, %cst {dimension_numbers = #tpu.dot_dimension_numbers<[1], [0], [0], [1], [0, 0, 1, 1], [], []>} : vector<200x36xbf16>, vector<36x32xbf16>, vector<200x32xf32> -> vector<200x32xf32>
    %cst_3 = arith.constant 0.000000e+00 : f32
    %4 = vector.broadcast %cst_3 : f32 to vector<200x32xf32>
    %5 = arith.maximumf %3, %4 : vector<200x32xf32>
    %6 = arith.truncf %5 : vector<200x32xf32> to vector<200x32xbf16>
    %c0_4 = arith.constant 0 : index
    %c0_5 = arith.constant 0 : index
    %7 = vector.load %arg3[%c0_4, %c0_5] : memref<200x32xbf16, #tpu.memory_space<vmem>>, vector<200x32xbf16>
    tpu.vector_store %arg3[%c0_4, %c0_5], %6 {strides = array<i32>} : memref<200x32xbf16, #tpu.memory_space<vmem>>, vector<200x32xbf16>,
    return
  }
  func.func @transform_0(%arg0: i32) -> (i32, i32) {
    %c0_i32 = arith.constant 0 : i32
    %c0_i32_0 = arith.constant 0 : i32
    return %arg0, %c0_i32 : i32, i32
  }
  func.func @transform_1(%arg0: i32) -> (i32, i32) {
    %c0_i32 = arith.constant 0 : i32
    %c0_i32_0 = arith.constant 0 : i32
    %c0_i32_1 = arith.constant 0 : i32
    return %c0_i32, %c0_i32_0 : i32, i32
  }
  func.func @transform_2(%arg0: i32) -> (i32, i32) {
    %c0_i32 = arith.constant 0 : i32
    %c0_i32_0 = arith.constant 0 : i32
    return %arg0, %c0_i32 : i32, i32
  }
}

module attributes {stable_mosaic.version = 11 : i64} {
  func.func @_maxpool_pos_kernel(%arg0: i32, %arg1: memref<1x9x16x32xbf16, #tpu.memory_space<vmem>>, %arg2: memref<16x32xf32, #tpu.memory_space<vmem>>, %arg3: memref<1x16x32xf32, #tpu.memory_space<vmem>>) attributes {dimension_semantics = [#tpu.dimension_semantics<parallel>], iteration_bounds = array<i64: 2>, scalar_prefetch = 0 : i64, scratch_operands = 0 : i64, tpu.core_type = #tpu.core_type<tc>, window_params = [{transform_indices = @transform_0, window_bounds = array<i64: 1, 9, 16, 32>}, {pipeline_mode = #tpu.pipeline_mode<synchronous>, transform_indices = @transform_1, window_bounds = array<i64: 16, 32>}, {transform_indices = @transform_2, window_bounds = array<i64: 1, 16, 32>}]} {
    %c0 = arith.constant 0 : index
    %c0_0 = arith.constant 0 : index
    %c0_1 = arith.constant 0 : index
    %c0_2 = arith.constant 0 : index
    %0 = vector.load %arg1[%c0, %c0_0, %c0_1, %c0_2] : memref<1x9x16x32xbf16, #tpu.memory_space<vmem>>, vector<1x1x16x32xbf16>
    %1 = vector.shape_cast %0 : vector<1x1x16x32xbf16> to vector<16x32xbf16>
    %c0_3 = arith.constant 0 : index
    %c1 = arith.constant 1 : index
    %c0_4 = arith.constant 0 : index
    %c0_5 = arith.constant 0 : index
    %2 = vector.load %arg1[%c0_3, %c1, %c0_4, %c0_5] : memref<1x9x16x32xbf16, #tpu.memory_space<vmem>>, vector<1x1x16x32xbf16>
    %3 = vector.shape_cast %2 : vector<1x1x16x32xbf16> to vector<16x32xbf16>
    %4 = arith.maximumf %1, %3 : vector<16x32xbf16>
    %c0_6 = arith.constant 0 : index
    %c2 = arith.constant 2 : index
    %c0_7 = arith.constant 0 : index
    %c0_8 = arith.constant 0 : index
    %5 = vector.load %arg1[%c0_6, %c2, %c0_7, %c0_8] : memref<1x9x16x32xbf16, #tpu.memory_space<vmem>>, vector<1x1x16x32xbf16>
    %6 = vector.shape_cast %5 : vector<1x1x16x32xbf16> to vector<16x32xbf16>
    %7 = arith.maximumf %4, %6 : vector<16x32xbf16>
    %c0_9 = arith.constant 0 : index
    %c3 = arith.constant 3 : index
    %c0_10 = arith.constant 0 : index
    %c0_11 = arith.constant 0 : index
    %8 = vector.load %arg1[%c0_9, %c3, %c0_10, %c0_11] : memref<1x9x16x32xbf16, #tpu.memory_space<vmem>>, vector<1x1x16x32xbf16>
    %9 = vector.shape_cast %8 : vector<1x1x16x32xbf16> to vector<16x32xbf16>
    %10 = arith.maximumf %7, %9 : vector<16x32xbf16>
    %c0_12 = arith.constant 0 : index
    %c4 = arith.constant 4 : index
    %c0_13 = arith.constant 0 : index
    %c0_14 = arith.constant 0 : index
    %11 = vector.load %arg1[%c0_12, %c4, %c0_13, %c0_14] : memref<1x9x16x32xbf16, #tpu.memory_space<vmem>>, vector<1x1x16x32xbf16>
    %12 = vector.shape_cast %11 : vector<1x1x16x32xbf16> to vector<16x32xbf16>
    %13 = arith.maximumf %10, %12 : vector<16x32xbf16>
    %c0_15 = arith.constant 0 : index
    %c5 = arith.constant 5 : index
    %c0_16 = arith.constant 0 : index
    %c0_17 = arith.constant 0 : index
    %14 = vector.load %arg1[%c0_15, %c5, %c0_16, %c0_17] : memref<1x9x16x32xbf16, #tpu.memory_space<vmem>>, vector<1x1x16x32xbf16>
    %15 = vector.shape_cast %14 : vector<1x1x16x32xbf16> to vector<16x32xbf16>
    %16 = arith.maximumf %13, %15 : vector<16x32xbf16>
    %c0_18 = arith.constant 0 : index
    %c6 = arith.constant 6 : index
    %c0_19 = arith.constant 0 : index
    %c0_20 = arith.constant 0 : index
    %17 = vector.load %arg1[%c0_18, %c6, %c0_19, %c0_20] : memref<1x9x16x32xbf16, #tpu.memory_space<vmem>>, vector<1x1x16x32xbf16>
    %18 = vector.shape_cast %17 : vector<1x1x16x32xbf16> to vector<16x32xbf16>
    %19 = arith.maximumf %16, %18 : vector<16x32xbf16>
    %c0_21 = arith.constant 0 : index
    %c7 = arith.constant 7 : index
    %c0_22 = arith.constant 0 : index
    %c0_23 = arith.constant 0 : index
    %20 = vector.load %arg1[%c0_21, %c7, %c0_22, %c0_23] : memref<1x9x16x32xbf16, #tpu.memory_space<vmem>>, vector<1x1x16x32xbf16>
    %21 = vector.shape_cast %20 : vector<1x1x16x32xbf16> to vector<16x32xbf16>
    %22 = arith.maximumf %19, %21 : vector<16x32xbf16>
    %c0_24 = arith.constant 0 : index
    %c8 = arith.constant 8 : index
    %c0_25 = arith.constant 0 : index
    %c0_26 = arith.constant 0 : index
    %23 = vector.load %arg1[%c0_24, %c8, %c0_25, %c0_26] : memref<1x9x16x32xbf16, #tpu.memory_space<vmem>>, vector<1x1x16x32xbf16>
    %24 = vector.shape_cast %23 : vector<1x1x16x32xbf16> to vector<16x32xbf16>
    %25 = arith.maximumf %22, %24 : vector<16x32xbf16>
    %26 = arith.extf %25 : vector<16x32xbf16> to vector<16x32xf32>
    %c0_27 = arith.constant 0 : index
    %c0_28 = arith.constant 0 : index
    %27 = vector.load %arg2[%c0_27, %c0_28] : memref<16x32xf32, #tpu.memory_space<vmem>>, vector<16x32xf32>
    %28 = arith.addf %26, %27 : vector<16x32xf32>
    %c0_29 = arith.constant 0 : index
    %c0_30 = arith.constant 0 : index
    %c0_31 = arith.constant 0 : index
    %29 = vector.load %arg3[%c0_29, %c0_30, %c0_31] : memref<1x16x32xf32, #tpu.memory_space<vmem>>, vector<1x16x32xf32>
    %30 = vector.shape_cast %29 : vector<1x16x32xf32> to vector<16x32xf32>
    %31 = vector.shape_cast %28 : vector<16x32xf32> to vector<1x16x32xf32>
    tpu.vector_store %arg3[%c0_29, %c0_30, %c0_31], %31 {strides = array<i32>} : memref<1x16x32xf32, #tpu.memory_space<vmem>>, vector<1x16x32xf32>,
    return
  }
  func.func @transform_0(%arg0: i32) -> (i32, i32, i32, i32) {
    %c0_i32 = arith.constant 0 : i32
    %c0_i32_0 = arith.constant 0 : i32
    %c0_i32_1 = arith.constant 0 : i32
    %c0_i32_2 = arith.constant 0 : i32
    return %arg0, %c0_i32, %c0_i32_0, %c0_i32_1 : i32, i32, i32, i32
  }
  func.func @transform_1(%arg0: i32) -> (i32, i32) {
    %c0_i32 = arith.constant 0 : i32
    %c0_i32_0 = arith.constant 0 : i32
    %c0_i32_1 = arith.constant 0 : i32
    return %c0_i32, %c0_i32_0 : i32, i32
  }
  func.func @transform_2(%arg0: i32) -> (i32, i32, i32) {
    %c0_i32 = arith.constant 0 : i32
    %c0_i32_0 = arith.constant 0 : i32
    %c0_i32_1 = arith.constant 0 : i32
    return %arg0, %c0_i32, %c0_i32_0 : i32, i32, i32
  }
}

module attributes {stable_mosaic.version = 11 : i64} {
  func.func @_ln_qkv_kernel(%arg0: i32, %arg1: memref<1x16x32xf32, #tpu.memory_space<vmem>>, %arg2: memref<1x32xf32, #tpu.memory_space<vmem>>, %arg3: memref<1x32xf32, #tpu.memory_space<vmem>>, %arg4: memref<32x128xbf16, #tpu.memory_space<vmem>>, %arg5: memref<1x128xf32, #tpu.memory_space<vmem>>, %arg6: memref<1x16x128xbf16, #tpu.memory_space<vmem>>) attributes {dimension_semantics = [#tpu.dimension_semantics<parallel>], iteration_bounds = array<i64: 2>, scalar_prefetch = 0 : i64, scratch_operands = 0 : i64, tpu.core_type = #tpu.core_type<tc>, window_params = [{transform_indices = @transform_0, window_bounds = array<i64: 1, 16, 32>}, {pipeline_mode = #tpu.pipeline_mode<synchronous>, transform_indices = @transform_1, window_bounds = array<i64: 1, 32>}, {pipeline_mode = #tpu.pipeline_mode<synchronous>, transform_indices = @transform_2, window_bounds = array<i64: 1, 32>}, {pipeline_mode = #tpu.pipeline_mode<synchronous>, transform_indices = @transform_3, window_bounds = array<i64: 32, 128>}, {pipeline_mode = #tpu.pipeline_mode<synchronous>, transform_indices = @transform_4, window_bounds = array<i64: 1, 128>}, {transform_indices = @transform_5, window_bounds = array<i64: 1, 16, 128>}]} {
    %c0 = arith.constant 0 : index
    %c0_0 = arith.constant 0 : index
    %c0_1 = arith.constant 0 : index
    %0 = vector.load %arg1[%c0, %c0_0, %c0_1] : memref<1x16x32xf32, #tpu.memory_space<vmem>>, vector<1x16x32xf32>
    %1 = vector.shape_cast %0 : vector<1x16x32xf32> to vector<16x32xf32>
    %c0_2 = arith.constant 0 : index
    %c0_3 = arith.constant 0 : index
    %2 = vector.load %arg2[%c0_2, %c0_3] : memref<1x32xf32, #tpu.memory_space<vmem>>, vector<1x32xf32>
    %c0_4 = arith.constant 0 : index
    %c0_5 = arith.constant 0 : index
    %3 = vector.load %arg3[%c0_4, %c0_5] : memref<1x32xf32, #tpu.memory_space<vmem>>, vector<1x32xf32>
    %cst = arith.constant dense<0.000000e+00> : vector<16xf32>
    %4 = vector.multi_reduction <add>, %1, %cst [1] : vector<16x32xf32> to vector<16xf32>
    %5 = vector.shape_cast %4 : vector<16xf32> to vector<16x1xf32>
    %cst_6 = arith.constant 3.200000e+01 : f32
    %6 = vector.broadcast %cst_6 : f32 to vector<16x1xf32>
    %7 = arith.divf %5, %6 : vector<16x1xf32>
    %8 = vector.broadcast %7 : vector<16x1xf32> to vector<16x32xf32>
    %9 = arith.subf %1, %8 : vector<16x32xf32>
    %10 = arith.mulf %9, %9 : vector<16x32xf32>
    %cst_7 = arith.constant dense<0.000000e+00> : vector<16xf32>
    %11 = vector.multi_reduction <add>, %10, %cst_7 [1] : vector<16x32xf32> to vector<16xf32>
    %12 = vector.shape_cast %11 : vector<16xf32> to vector<16x1xf32>
    %cst_8 = arith.constant 3.200000e+01 : f32
    %13 = vector.broadcast %cst_8 : f32 to vector<16x1xf32>
    %14 = arith.divf %12, %13 : vector<16x1xf32>
    %15 = vector.broadcast %7 : vector<16x1xf32> to vector<16x32xf32>
    %16 = arith.subf %1, %15 : vector<16x32xf32>
    %cst_9 = arith.constant 9.99999974E-6 : f32
    %17 = vector.broadcast %cst_9 : f32 to vector<16x1xf32>
    %18 = arith.addf %14, %17 : vector<16x1xf32>
    %19 = math.rsqrt %18 : vector<16x1xf32>
    %20 = vector.broadcast %19 : vector<16x1xf32> to vector<16x32xf32>
    %21 = arith.mulf %16, %20 : vector<16x32xf32>
    %22 = vector.broadcast %2 : vector<1x32xf32> to vector<16x32xf32>
    %23 = arith.mulf %21, %22 : vector<16x32xf32>
    %24 = vector.broadcast %3 : vector<1x32xf32> to vector<16x32xf32>
    %25 = arith.addf %23, %24 : vector<16x32xf32>
    %26 = arith.truncf %25 : vector<16x32xf32> to vector<16x32xbf16>
    %c0_10 = arith.constant 0 : index
    %c0_11 = arith.constant 0 : index
    %27 = vector.load %arg4[%c0_10, %c0_11] : memref<32x128xbf16, #tpu.memory_space<vmem>>, vector<32x128xbf16>
    %cst_12 = arith.constant dense<0.000000e+00> : vector<16x128xf32>
    %28 = tpu.matmul %26, %27, %cst_12 {dimension_numbers = #tpu.dot_dimension_numbers<[1], [0], [0], [1], [0, 0, 1, 1], [], []>} : vector<16x32xbf16>, vector<32x128xbf16>, vector<16x128xf32> -> vector<16x128xf32>
    %c0_13 = arith.constant 0 : index
    %c0_14 = arith.constant 0 : index
    %29 = vector.load %arg5[%c0_13, %c0_14] : memref<1x128xf32, #tpu.memory_space<vmem>>, vector<1x128xf32>
    %30 = vector.broadcast %29 : vector<1x128xf32> to vector<16x128xf32>
    %31 = arith.addf %28, %30 : vector<16x128xf32>
    %32 = arith.truncf %31 : vector<16x128xf32> to vector<16x128xbf16>
    %c0_15 = arith.constant 0 : index
    %c0_16 = arith.constant 0 : index
    %c0_17 = arith.constant 0 : index
    %33 = vector.load %arg6[%c0_15, %c0_16, %c0_17] : memref<1x16x128xbf16, #tpu.memory_space<vmem>>, vector<1x16x128xbf16>
    %34 = vector.shape_cast %33 : vector<1x16x128xbf16> to vector<16x128xbf16>
    %35 = vector.shape_cast %32 : vector<16x128xbf16> to vector<1x16x128xbf16>
    tpu.vector_store %arg6[%c0_15, %c0_16, %c0_17], %35 {strides = array<i32>} : memref<1x16x128xbf16, #tpu.memory_space<vmem>>, vector<1x16x128xbf16>,
    return
  }
  func.func @transform_0(%arg0: i32) -> (i32, i32, i32) {
    %c0_i32 = arith.constant 0 : i32
    %c0_i32_0 = arith.constant 0 : i32
    %c0_i32_1 = arith.constant 0 : i32
    return %arg0, %c0_i32, %c0_i32_0 : i32, i32, i32
  }
  func.func @transform_1(%arg0: i32) -> (i32, i32) {
    %c0_i32 = arith.constant 0 : i32
    %c0_i32_0 = arith.constant 0 : i32
    %c0_i32_1 = arith.constant 0 : i32
    return %c0_i32, %c0_i32_0 : i32, i32
  }
  func.func @transform_2(%arg0: i32) -> (i32, i32) {
    %c0_i32 = arith.constant 0 : i32
    %c0_i32_0 = arith.constant 0 : i32
    %c0_i32_1 = arith.constant 0 : i32
    return %c0_i32, %c0_i32_0 : i32, i32
  }
  func.func @transform_3(%arg0: i32) -> (i32, i32) {
    %c0_i32 = arith.constant 0 : i32
    %c0_i32_0 = arith.constant 0 : i32
    %c0_i32_1 = arith.constant 0 : i32
    return %c0_i32, %c0_i32_0 : i32, i32
  }
  func.func @transform_4(%arg0: i32) -> (i32, i32) {
    %c0_i32 = arith.constant 0 : i32
    %c0_i32_0 = arith.constant 0 : i32
    %c0_i32_1 = arith.constant 0 : i32
    return %c0_i32, %c0_i32_0 : i32, i32
  }
  func.func @transform_5(%arg0: i32) -> (i32, i32, i32) {
    %c0_i32 = arith.constant 0 : i32
    %c0_i32_0 = arith.constant 0 : i32
    %c0_i32_1 = arith.constant 0 : i32
    return %arg0, %c0_i32, %c0_i32_0 : i32, i32, i32
  }
}

module attributes {stable_mosaic.version = 11 : i64} {
  func.func @_attn_kernel(%arg0: i32, %arg1: memref<1x16x128xbf16, #tpu.memory_space<vmem>>, %arg2: memref<32x32xbf16, #tpu.memory_space<vmem>>, %arg3: memref<1x32xf32, #tpu.memory_space<vmem>>, %arg4: memref<1x16x32xf32, #tpu.memory_space<vmem>>, %arg5: memref<1x16x32xf32, #tpu.memory_space<vmem>>) attributes {dimension_semantics = [#tpu.dimension_semantics<parallel>], iteration_bounds = array<i64: 2>, scalar_prefetch = 0 : i64, scratch_operands = 0 : i64, tpu.core_type = #tpu.core_type<tc>, window_params = [{transform_indices = @transform_0, window_bounds = array<i64: 1, 16, 128>}, {pipeline_mode = #tpu.pipeline_mode<synchronous>, transform_indices = @transform_1, window_bounds = array<i64: 32, 32>}, {pipeline_mode = #tpu.pipeline_mode<synchronous>, transform_indices = @transform_2, window_bounds = array<i64: 1, 32>}, {transform_indices = @transform_3, window_bounds = array<i64: 1, 16, 32>}, {transform_indices = @transform_4, window_bounds = array<i64: 1, 16, 32>}]} {
    %c0 = arith.constant 0 : index
    %c0_0 = arith.constant 0 : index
    %c0_1 = arith.constant 0 : index
    %0 = vector.load %arg1[%c0, %c0_0, %c0_1] : memref<1x16x128xbf16, #tpu.memory_space<vmem>>, vector<1x16x128xbf16>
    %1 = vector.shape_cast %0 : vector<1x16x128xbf16> to vector<16x128xbf16>
    %2 = vector.extract_strided_slice %1 {offsets = [0, 0], sizes = [16, 16], strides = [1, 1]} : vector<16x128xbf16> to vector<16x16xbf16>
    %3 = vector.extract_strided_slice %1 {offsets = [0, 32], sizes = [16, 16], strides = [1, 1]} : vector<16x128xbf16> to vector<16x16xbf16>
    %4 = vector.extract_strided_slice %1 {offsets = [0, 64], sizes = [16, 16], strides = [1, 1]} : vector<16x128xbf16> to vector<16x16xbf16>
    %cst = arith.constant dense<0.000000e+00> : vector<16x16xf32>
    %5 = tpu.matmul %2, %3, %cst {dimension_numbers = #tpu.dot_dimension_numbers<[1], [1], [0], [0], [0, 0, 1, 0], [], []>} : vector<16x16xbf16>, vector<16x16xbf16>, vector<16x16xf32> -> vector<16x16xf32>
    %cst_2 = arith.constant 2.500000e-01 : f32
    %6 = vector.broadcast %cst_2 : f32 to vector<16x16xf32>
    %7 = arith.mulf %5, %6 : vector<16x16xf32>
    %cst_3 = arith.constant dense<0xFF800000> : vector<16xf32>
    %8 = vector.multi_reduction <maximumf>, %7, %cst_3 [1] : vector<16x16xf32> to vector<16xf32>
    %9 = vector.shape_cast %8 : vector<16xf32> to vector<16x1xf32>
    %10 = vector.broadcast %9 : vector<16x1xf32> to vector<16x16xf32>
    %11 = arith.subf %7, %10 : vector<16x16xf32>
    %12 = math.exp %11 : vector<16x16xf32>
    %cst_4 = arith.constant dense<0.000000e+00> : vector<16xf32>
    %13 = vector.multi_reduction <add>, %12, %cst_4 [1] : vector<16x16xf32> to vector<16xf32>
    %14 = vector.shape_cast %13 : vector<16xf32> to vector<16x1xf32>
    %15 = tpu.reciprocal %14 {approx = true} : vector<16x1xf32> -> vector<16x1xf32>
    %16 = vector.broadcast %15 : vector<16x1xf32> to vector<16x16xf32>
    %17 = arith.mulf %12, %16 : vector<16x16xf32>
    %18 = arith.truncf %17 : vector<16x16xf32> to vector<16x16xbf16>
    %cst_5 = arith.constant dense<0.000000e+00> : vector<16x16xf32>
    %19 = tpu.matmul %18, %4, %cst_5 {dimension_numbers = #tpu.dot_dimension_numbers<[1], [0], [0], [1], [0, 0, 1, 1], [], []>} : vector<16x16xbf16>, vector<16x16xbf16>, vector<16x16xf32> -> vector<16x16xf32>
    %20 = vector.extract_strided_slice %1 {offsets = [0, 16], sizes = [16, 16], strides = [1, 1]} : vector<16x128xbf16> to vector<16x16xbf16>
    %21 = vector.extract_strided_slice %1 {offsets = [0, 48], sizes = [16, 16], strides = [1, 1]} : vector<16x128xbf16> to vector<16x16xbf16>
    %22 = vector.extract_strided_slice %1 {offsets = [0, 80], sizes = [16, 16], strides = [1, 1]} : vector<16x128xbf16> to vector<16x16xbf16>
    %cst_6 = arith.constant dense<0.000000e+00> : vector<16x16xf32>
    %23 = tpu.matmul %20, %21, %cst_6 {dimension_numbers = #tpu.dot_dimension_numbers<[1], [1], [0], [0], [0, 0, 1, 0], [], []>} : vector<16x16xbf16>, vector<16x16xbf16>, vector<16x16xf32> -> vector<16x16xf32>
    %cst_7 = arith.constant 2.500000e-01 : f32
    %24 = vector.broadcast %cst_7 : f32 to vector<16x16xf32>
    %25 = arith.mulf %23, %24 : vector<16x16xf32>
    %cst_8 = arith.constant dense<0xFF800000> : vector<16xf32>
    %26 = vector.multi_reduction <maximumf>, %25, %cst_8 [1] : vector<16x16xf32> to vector<16xf32>
    %27 = vector.shape_cast %26 : vector<16xf32> to vector<16x1xf32>
    %28 = vector.broadcast %27 : vector<16x1xf32> to vector<16x16xf32>
    %29 = arith.subf %25, %28 : vector<16x16xf32>
    %30 = math.exp %29 : vector<16x16xf32>
    %cst_9 = arith.constant dense<0.000000e+00> : vector<16xf32>
    %31 = vector.multi_reduction <add>, %30, %cst_9 [1] : vector<16x16xf32> to vector<16xf32>
    %32 = vector.shape_cast %31 : vector<16xf32> to vector<16x1xf32>
    %33 = tpu.reciprocal %32 {approx = true} : vector<16x1xf32> -> vector<16x1xf32>
    %34 = vector.broadcast %33 : vector<16x1xf32> to vector<16x16xf32>
    %35 = arith.mulf %30, %34 : vector<16x16xf32>
    %36 = arith.truncf %35 : vector<16x16xf32> to vector<16x16xbf16>
    %cst_10 = arith.constant dense<0.000000e+00> : vector<16x16xf32>
    %37 = tpu.matmul %36, %22, %cst_10 {dimension_numbers = #tpu.dot_dimension_numbers<[1], [0], [0], [1], [0, 0, 1, 1], [], []>} : vector<16x16xbf16>, vector<16x16xbf16>, vector<16x16xf32> -> vector<16x16xf32>
    %38 = tpu.concatenate %19, %37 in 1 : vector<16x16xf32>, vector<16x16xf32> -> vector<16x32xf32>
    %39 = arith.truncf %38 : vector<16x32xf32> to vector<16x32xbf16>
    %c0_11 = arith.constant 0 : index
    %c0_12 = arith.constant 0 : index
    %40 = vector.load %arg2[%c0_11, %c0_12] : memref<32x32xbf16, #tpu.memory_space<vmem>>, vector<32x32xbf16>
    %cst_13 = arith.constant dense<0.000000e+00> : vector<16x32xf32>
    %41 = tpu.matmul %39, %40, %cst_13 {dimension_numbers = #tpu.dot_dimension_numbers<[1], [0], [0], [1], [0, 0, 1, 1], [], []>} : vector<16x32xbf16>, vector<32x32xbf16>, vector<16x32xf32> -> vector<16x32xf32>
    %c0_14 = arith.constant 0 : index
    %c0_15 = arith.constant 0 : index
    %c0_16 = arith.constant 0 : index
    %42 = vector.load %arg4[%c0_14, %c0_15, %c0_16] : memref<1x16x32xf32, #tpu.memory_space<vmem>>, vector<1x16x32xf32>
    %43 = vector.shape_cast %42 : vector<1x16x32xf32> to vector<16x32xf32>
    %44 = arith.addf %43, %41 : vector<16x32xf32>
    %c0_17 = arith.constant 0 : index
    %c0_18 = arith.constant 0 : index
    %45 = vector.load %arg3[%c0_17, %c0_18] : memref<1x32xf32, #tpu.memory_space<vmem>>, vector<1x32xf32>
    %46 = vector.broadcast %45 : vector<1x32xf32> to vector<16x32xf32>
    %47 = arith.addf %44, %46 : vector<16x32xf32>
    %c0_19 = arith.constant 0 : index
    %c0_20 = arith.constant 0 : index
    %c0_21 = arith.constant 0 : index
    %48 = vector.load %arg5[%c0_19, %c0_20, %c0_21] : memref<1x16x32xf32, #tpu.memory_space<vmem>>, vector<1x16x32xf32>
    %49 = vector.shape_cast %48 : vector<1x16x32xf32> to vector<16x32xf32>
    %50 = vector.shape_cast %47 : vector<16x32xf32> to vector<1x16x32xf32>
    tpu.vector_store %arg5[%c0_19, %c0_20, %c0_21], %50 {strides = array<i32>} : memref<1x16x32xf32, #tpu.memory_space<vmem>>, vector<1x16x32xf32>,
    return
  }
  func.func @transform_0(%arg0: i32) -> (i32, i32, i32) {
    %c0_i32 = arith.constant 0 : i32
    %c0_i32_0 = arith.constant 0 : i32
    %c0_i32_1 = arith.constant 0 : i32
    return %arg0, %c0_i32, %c0_i32_0 : i32, i32, i32
  }
  func.func @transform_1(%arg0: i32) -> (i32, i32) {
    %c0_i32 = arith.constant 0 : i32
    %c0_i32_0 = arith.constant 0 : i32
    %c0_i32_1 = arith.constant 0 : i32
    return %c0_i32, %c0_i32_0 : i32, i32
  }
  func.func @transform_2(%arg0: i32) -> (i32, i32) {
    %c0_i32 = arith.constant 0 : i32
    %c0_i32_0 = arith.constant 0 : i32
    %c0_i32_1 = arith.constant 0 : i32
    return %c0_i32, %c0_i32_0 : i32, i32
  }
  func.func @transform_3(%arg0: i32) -> (i32, i32, i32) {
    %c0_i32 = arith.constant 0 : i32
    %c0_i32_0 = arith.constant 0 : i32
    %c0_i32_1 = arith.constant 0 : i32
    return %arg0, %c0_i32, %c0_i32_0 : i32, i32, i32
  }
  func.func @transform_4(%arg0: i32) -> (i32, i32, i32) {
    %c0_i32 = arith.constant 0 : i32
    %c0_i32_0 = arith.constant 0 : i32
    %c0_i32_1 = arith.constant 0 : i32
    return %arg0, %c0_i32, %c0_i32_0 : i32, i32, i32
  }
}

module attributes {stable_mosaic.version = 11 : i64} {
  func.func @_ln_mlp_kernel(%arg0: i32, %arg1: memref<1x16x32xf32, #tpu.memory_space<vmem>>, %arg2: memref<1x32xf32, #tpu.memory_space<vmem>>, %arg3: memref<1x32xf32, #tpu.memory_space<vmem>>, %arg4: memref<32x64xbf16, #tpu.memory_space<vmem>>, %arg5: memref<1x64xf32, #tpu.memory_space<vmem>>, %arg6: memref<64x32xbf16, #tpu.memory_space<vmem>>, %arg7: memref<1x32xf32, #tpu.memory_space<vmem>>, %arg8: memref<1x16x32xf32, #tpu.memory_space<vmem>>) attributes {dimension_semantics = [#tpu.dimension_semantics<parallel>], iteration_bounds = array<i64: 2>, scalar_prefetch = 0 : i64, scratch_operands = 0 : i64, tpu.core_type = #tpu.core_type<tc>, window_params = [{transform_indices = @transform_0, window_bounds = array<i64: 1, 16, 32>}, {pipeline_mode = #tpu.pipeline_mode<synchronous>, transform_indices = @transform_1, window_bounds = array<i64: 1, 32>}, {pipeline_mode = #tpu.pipeline_mode<synchronous>, transform_indices = @transform_2, window_bounds = array<i64: 1, 32>}, {pipeline_mode = #tpu.pipeline_mode<synchronous>, transform_indices = @transform_3, window_bounds = array<i64: 32, 64>}, {pipeline_mode = #tpu.pipeline_mode<synchronous>, transform_indices = @transform_4, window_bounds = array<i64: 1, 64>}, {pipeline_mode = #tpu.pipeline_mode<synchronous>, transform_indices = @transform_5, window_bounds = array<i64: 64, 32>}, {pipeline_mode = #tpu.pipeline_mode<synchronous>, transform_indices = @transform_6, window_bounds = array<i64: 1, 32>}, {transform_indices = @transform_7, window_bounds = array<i64: 1, 16, 32>}]} {
    %c0 = arith.constant 0 : index
    %c0_0 = arith.constant 0 : index
    %c0_1 = arith.constant 0 : index
    %0 = vector.load %arg1[%c0, %c0_0, %c0_1] : memref<1x16x32xf32, #tpu.memory_space<vmem>>, vector<1x16x32xf32>
    %1 = vector.shape_cast %0 : vector<1x16x32xf32> to vector<16x32xf32>
    %c0_2 = arith.constant 0 : index
    %c0_3 = arith.constant 0 : index
    %2 = vector.load %arg2[%c0_2, %c0_3] : memref<1x32xf32, #tpu.memory_space<vmem>>, vector<1x32xf32>
    %c0_4 = arith.constant 0 : index
    %c0_5 = arith.constant 0 : index
    %3 = vector.load %arg3[%c0_4, %c0_5] : memref<1x32xf32, #tpu.memory_space<vmem>>, vector<1x32xf32>
    %cst = arith.constant dense<0.000000e+00> : vector<16xf32>
    %4 = vector.multi_reduction <add>, %1, %cst [1] : vector<16x32xf32> to vector<16xf32>
    %5 = vector.shape_cast %4 : vector<16xf32> to vector<16x1xf32>
    %cst_6 = arith.constant 3.200000e+01 : f32
    %6 = vector.broadcast %cst_6 : f32 to vector<16x1xf32>
    %7 = arith.divf %5, %6 : vector<16x1xf32>
    %8 = vector.broadcast %7 : vector<16x1xf32> to vector<16x32xf32>
    %9 = arith.subf %1, %8 : vector<16x32xf32>
    %10 = arith.mulf %9, %9 : vector<16x32xf32>
    %cst_7 = arith.constant dense<0.000000e+00> : vector<16xf32>
    %11 = vector.multi_reduction <add>, %10, %cst_7 [1] : vector<16x32xf32> to vector<16xf32>
    %12 = vector.shape_cast %11 : vector<16xf32> to vector<16x1xf32>
    %cst_8 = arith.constant 3.200000e+01 : f32
    %13 = vector.broadcast %cst_8 : f32 to vector<16x1xf32>
    %14 = arith.divf %12, %13 : vector<16x1xf32>
    %15 = vector.broadcast %7 : vector<16x1xf32> to vector<16x32xf32>
    %16 = arith.subf %1, %15 : vector<16x32xf32>
    %cst_9 = arith.constant 9.99999974E-6 : f32
    %17 = vector.broadcast %cst_9 : f32 to vector<16x1xf32>
    %18 = arith.addf %14, %17 : vector<16x1xf32>
    %19 = math.rsqrt %18 : vector<16x1xf32>
    %20 = vector.broadcast %19 : vector<16x1xf32> to vector<16x32xf32>
    %21 = arith.mulf %16, %20 : vector<16x32xf32>
    %22 = vector.broadcast %2 : vector<1x32xf32> to vector<16x32xf32>
    %23 = arith.mulf %21, %22 : vector<16x32xf32>
    %24 = vector.broadcast %3 : vector<1x32xf32> to vector<16x32xf32>
    %25 = arith.addf %23, %24 : vector<16x32xf32>
    %26 = arith.truncf %25 : vector<16x32xf32> to vector<16x32xbf16>
    %c0_10 = arith.constant 0 : index
    %c0_11 = arith.constant 0 : index
    %27 = vector.load %arg4[%c0_10, %c0_11] : memref<32x64xbf16, #tpu.memory_space<vmem>>, vector<32x64xbf16>
    %cst_12 = arith.constant dense<0.000000e+00> : vector<16x64xf32>
    %28 = tpu.matmul %26, %27, %cst_12 {dimension_numbers = #tpu.dot_dimension_numbers<[1], [0], [0], [1], [0, 0, 1, 1], [], []>} : vector<16x32xbf16>, vector<32x64xbf16>, vector<16x64xf32> -> vector<16x64xf32>
    %c0_13 = arith.constant 0 : index
    %c0_14 = arith.constant 0 : index
    %29 = vector.load %arg5[%c0_13, %c0_14] : memref<1x64xf32, #tpu.memory_space<vmem>>, vector<1x64xf32>
    %30 = vector.broadcast %29 : vector<1x64xf32> to vector<16x64xf32>
    %31 = arith.addf %28, %30 : vector<16x64xf32>
    %32 = arith.mulf %31, %31 : vector<16x64xf32>
    %33 = arith.mulf %31, %32 : vector<16x64xf32>
    %cst_15 = arith.constant 4.471500e-02 : f32
    %34 = vector.broadcast %cst_15 : f32 to vector<16x64xf32>
    %35 = arith.mulf %34, %33 : vector<16x64xf32>
    %36 = arith.addf %31, %35 : vector<16x64xf32>
    %cst_16 = arith.constant 0.797884583 : f32
    %37 = vector.broadcast %cst_16 : f32 to vector<16x64xf32>
    %38 = arith.mulf %37, %36 : vector<16x64xf32>
    %39 = math.tanh %38 : vector<16x64xf32>
    %cst_17 = arith.constant 1.000000e+00 : f32
    %40 = vector.broadcast %cst_17 : f32 to vector<16x64xf32>
    %41 = arith.addf %40, %39 : vector<16x64xf32>
    %cst_18 = arith.constant 5.000000e-01 : f32
    %42 = vector.broadcast %cst_18 : f32 to vector<16x64xf32>
    %43 = arith.mulf %42, %41 : vector<16x64xf32>
    %44 = arith.mulf %31, %43 : vector<16x64xf32>
    %45 = arith.truncf %44 : vector<16x64xf32> to vector<16x64xbf16>
    %c0_19 = arith.constant 0 : index
    %c0_20 = arith.constant 0 : index
    %46 = vector.load %arg6[%c0_19, %c0_20] : memref<64x32xbf16, #tpu.memory_space<vmem>>, vector<64x32xbf16>
    %cst_21 = arith.constant dense<0.000000e+00> : vector<16x32xf32>
    %47 = tpu.matmul %45, %46, %cst_21 {dimension_numbers = #tpu.dot_dimension_numbers<[1], [0], [0], [1], [0, 0, 1, 1], [], []>} : vector<16x64xbf16>, vector<64x32xbf16>, vector<16x32xf32> -> vector<16x32xf32>
    %48 = arith.addf %1, %47 : vector<16x32xf32>
    %c0_22 = arith.constant 0 : index
    %c0_23 = arith.constant 0 : index
    %49 = vector.load %arg7[%c0_22, %c0_23] : memref<1x32xf32, #tpu.memory_space<vmem>>, vector<1x32xf32>
    %50 = vector.broadcast %49 : vector<1x32xf32> to vector<16x32xf32>
    %51 = arith.addf %48, %50 : vector<16x32xf32>
    %c0_24 = arith.constant 0 : index
    %c0_25 = arith.constant 0 : index
    %c0_26 = arith.constant 0 : index
    %52 = vector.load %arg8[%c0_24, %c0_25, %c0_26] : memref<1x16x32xf32, #tpu.memory_space<vmem>>, vector<1x16x32xf32>
    %53 = vector.shape_cast %52 : vector<1x16x32xf32> to vector<16x32xf32>
    %54 = vector.shape_cast %51 : vector<16x32xf32> to vector<1x16x32xf32>
    tpu.vector_store %arg8[%c0_24, %c0_25, %c0_26], %54 {strides = array<i32>} : memref<1x16x32xf32, #tpu.memory_space<vmem>>, vector<1x16x32xf32>,
    return
  }
  func.func @transform_0(%arg0: i32) -> (i32, i32, i32) {
    %c0_i32 = arith.constant 0 : i32
    %c0_i32_0 = arith.constant 0 : i32
    %c0_i32_1 = arith.constant 0 : i32
    return %arg0, %c0_i32, %c0_i32_0 : i32, i32, i32
  }
  func.func @transform_1(%arg0: i32) -> (i32, i32) {
    %c0_i32 = arith.constant 0 : i32
    %c0_i32_0 = arith.constant 0 : i32
    %c0_i32_1 = arith.constant 0 : i32
    return %c0_i32, %c0_i32_0 : i32, i32
  }
  func.func @transform_2(%arg0: i32) -> (i32, i32) {
    %c0_i32 = arith.constant 0 : i32
    %c0_i32_0 = arith.constant 0 : i32
    %c0_i32_1 = arith.constant 0 : i32
    return %c0_i32, %c0_i32_0 : i32, i32
  }
  func.func @transform_3(%arg0: i32) -> (i32, i32) {
    %c0_i32 = arith.constant 0 : i32
    %c0_i32_0 = arith.constant 0 : i32
    %c0_i32_1 = arith.constant 0 : i32
    return %c0_i32, %c0_i32_0 : i32, i32
  }
  func.func @transform_4(%arg0: i32) -> (i32, i32) {
    %c0_i32 = arith.constant 0 : i32
    %c0_i32_0 = arith.constant 0 : i32
    %c0_i32_1 = arith.constant 0 : i32
    return %c0_i32, %c0_i32_0 : i32, i32
  }
  func.func @transform_5(%arg0: i32) -> (i32, i32) {
    %c0_i32 = arith.constant 0 : i32
    %c0_i32_0 = arith.constant 0 : i32
    %c0_i32_1 = arith.constant 0 : i32
    return %c0_i32, %c0_i32_0 : i32, i32
  }
  func.func @transform_6(%arg0: i32) -> (i32, i32) {
    %c0_i32 = arith.constant 0 : i32
    %c0_i32_0 = arith.constant 0 : i32
    %c0_i32_1 = arith.constant 0 : i32
    return %c0_i32, %c0_i32_0 : i32, i32
  }
  func.func @transform_7(%arg0: i32) -> (i32, i32, i32) {
    %c0_i32 = arith.constant 0 : i32
    %c0_i32_0 = arith.constant 0 : i32
    %c0_i32_1 = arith.constant 0 : i32
    return %arg0, %c0_i32, %c0_i32_0 : i32, i32, i32
  }
}

module attributes {stable_mosaic.version = 11 : i64} {
  func.func @_head_kernel(%arg0: i32, %arg1: memref<1x16x32xf32, #tpu.memory_space<vmem>>, %arg2: memref<1x32xf32, #tpu.memory_space<vmem>>, %arg3: memref<1x32xf32, #tpu.memory_space<vmem>>, %arg4: memref<1x32xf32, #tpu.memory_space<vmem>>, %arg5: memref<1x1xf32, #tpu.memory_space<vmem>>, %arg6: memref<32x128xbf16, #tpu.memory_space<vmem>>, %arg7: memref<1x128xf32, #tpu.memory_space<vmem>>, %arg8: memref<1x1x128xf32, #tpu.memory_space<vmem>>) attributes {dimension_semantics = [#tpu.dimension_semantics<parallel>], iteration_bounds = array<i64: 2>, scalar_prefetch = 0 : i64, scratch_operands = 0 : i64, tpu.core_type = #tpu.core_type<tc>, window_params = [{transform_indices = @transform_0, window_bounds = array<i64: 1, 16, 32>}, {pipeline_mode = #tpu.pipeline_mode<synchronous>, transform_indices = @transform_1, window_bounds = array<i64: 1, 32>}, {pipeline_mode = #tpu.pipeline_mode<synchronous>, transform_indices = @transform_2, window_bounds = array<i64: 1, 32>}, {pipeline_mode = #tpu.pipeline_mode<synchronous>, transform_indices = @transform_3, window_bounds = array<i64: 1, 32>}, {pipeline_mode = #tpu.pipeline_mode<synchronous>, transform_indices = @transform_4, window_bounds = array<i64: 1, 1>}, {pipeline_mode = #tpu.pipeline_mode<synchronous>, transform_indices = @transform_5, window_bounds = array<i64: 32, 128>}, {pipeline_mode = #tpu.pipeline_mode<synchronous>, transform_indices = @transform_6, window_bounds = array<i64: 1, 128>}, {transform_indices = @transform_7, window_bounds = array<i64: 1, 1, 128>}]} {
    %c0 = arith.constant 0 : index
    %c0_0 = arith.constant 0 : index
    %c0_1 = arith.constant 0 : index
    %0 = vector.load %arg1[%c0, %c0_0, %c0_1] : memref<1x16x32xf32, #tpu.memory_space<vmem>>, vector<1x16x32xf32>
    %1 = vector.shape_cast %0 : vector<1x16x32xf32> to vector<16x32xf32>
    %c0_2 = arith.constant 0 : index
    %c0_3 = arith.constant 0 : index
    %2 = vector.load %arg2[%c0_2, %c0_3] : memref<1x32xf32, #tpu.memory_space<vmem>>, vector<1x32xf32>
    %c0_4 = arith.constant 0 : index
    %c0_5 = arith.constant 0 : index
    %3 = vector.load %arg3[%c0_4, %c0_5] : memref<1x32xf32, #tpu.memory_space<vmem>>, vector<1x32xf32>
    %cst = arith.constant dense<0.000000e+00> : vector<16xf32>
    %4 = vector.multi_reduction <add>, %1, %cst [1] : vector<16x32xf32> to vector<16xf32>
    %5 = vector.shape_cast %4 : vector<16xf32> to vector<16x1xf32>
    %cst_6 = arith.constant 3.200000e+01 : f32
    %6 = vector.broadcast %cst_6 : f32 to vector<16x1xf32>
    %7 = arith.divf %5, %6 : vector<16x1xf32>
    %8 = vector.broadcast %7 : vector<16x1xf32> to vector<16x32xf32>
    %9 = arith.subf %1, %8 : vector<16x32xf32>
    %10 = arith.mulf %9, %9 : vector<16x32xf32>
    %cst_7 = arith.constant dense<0.000000e+00> : vector<16xf32>
    %11 = vector.multi_reduction <add>, %10, %cst_7 [1] : vector<16x32xf32> to vector<16xf32>
    %12 = vector.shape_cast %11 : vector<16xf32> to vector<16x1xf32>
    %cst_8 = arith.constant 3.200000e+01 : f32
    %13 = vector.broadcast %cst_8 : f32 to vector<16x1xf32>
    %14 = arith.divf %12, %13 : vector<16x1xf32>
    %15 = vector.broadcast %7 : vector<16x1xf32> to vector<16x32xf32>
    %16 = arith.subf %1, %15 : vector<16x32xf32>
    %cst_9 = arith.constant 9.99999974E-6 : f32
    %17 = vector.broadcast %cst_9 : f32 to vector<16x1xf32>
    %18 = arith.addf %14, %17 : vector<16x1xf32>
    %19 = math.rsqrt %18 : vector<16x1xf32>
    %20 = vector.broadcast %19 : vector<16x1xf32> to vector<16x32xf32>
    %21 = arith.mulf %16, %20 : vector<16x32xf32>
    %22 = vector.broadcast %2 : vector<1x32xf32> to vector<16x32xf32>
    %23 = arith.mulf %21, %22 : vector<16x32xf32>
    %24 = vector.broadcast %3 : vector<1x32xf32> to vector<16x32xf32>
    %25 = arith.addf %23, %24 : vector<16x32xf32>
    %c0_10 = arith.constant 0 : index
    %c0_11 = arith.constant 0 : index
    %26 = vector.load %arg4[%c0_10, %c0_11] : memref<1x32xf32, #tpu.memory_space<vmem>>, vector<1x32xf32>
    %cst_12 = arith.constant dense<0.000000e+00> : vector<1x16xf32>
    %27 = tpu.matmul %26, %25, %cst_12 {dimension_numbers = #tpu.dot_dimension_numbers<[1], [1], [0], [0], [0, 0, 1, 0], [], []>} : vector<1x32xf32>, vector<16x32xf32>, vector<1x16xf32> -> vector<1x16xf32>
    %c0_13 = arith.constant 0 : index
    %c0_14 = arith.constant 0 : index
    %28 = vector.load %arg5[%c0_13, %c0_14] : memref<1x1xf32, #tpu.memory_space<vmem>>, vector<1x1xf32>
    %29 = vector.broadcast %28 : vector<1x1xf32> to vector<1x16xf32>
    %30 = arith.addf %27, %29 : vector<1x16xf32>
    %cst_15 = arith.constant dense<0xFF800000> : vector<1xf32>
    %31 = vector.multi_reduction <maximumf>, %30, %cst_15 [1] : vector<1x16xf32> to vector<1xf32>
    %32 = vector.shape_cast %31 : vector<1xf32> to vector<1x1xf32>
    %33 = vector.broadcast %32 : vector<1x1xf32> to vector<1x16xf32>
    %34 = arith.subf %30, %33 : vector<1x16xf32>
    %35 = math.exp %34 : vector<1x16xf32>
    %cst_16 = arith.constant dense<0.000000e+00> : vector<1xf32>
    %36 = vector.multi_reduction <add>, %35, %cst_16 [1] : vector<1x16xf32> to vector<1xf32>
    %37 = vector.shape_cast %36 : vector<1xf32> to vector<1x1xf32>
    %38 = tpu.reciprocal %37 {approx = true} : vector<1x1xf32> -> vector<1x1xf32>
    %39 = vector.broadcast %38 : vector<1x1xf32> to vector<1x16xf32>
    %40 = arith.mulf %35, %39 : vector<1x16xf32>
    %cst_17 = arith.constant dense<0.000000e+00> : vector<1x32xf32>
    %41 = tpu.matmul %40, %25, %cst_17 {dimension_numbers = #tpu.dot_dimension_numbers<[1], [0], [0], [1], [0, 0, 1, 1], [], []>} : vector<1x16xf32>, vector<16x32xf32>, vector<1x32xf32> -> vector<1x32xf32>
    %42 = arith.truncf %41 : vector<1x32xf32> to vector<1x32xbf16>
    %c0_18 = arith.constant 0 : index
    %c0_19 = arith.constant 0 : index
    %43 = vector.load %arg6[%c0_18, %c0_19] : memref<32x128xbf16, #tpu.memory_space<vmem>>, vector<32x128xbf16>
    %cst_20 = arith.constant dense<0.000000e+00> : vector<1x128xf32>
    %44 = tpu.matmul %42, %43, %cst_20 {dimension_numbers = #tpu.dot_dimension_numbers<[1], [0], [0], [1], [0, 0, 1, 1], [], []>} : vector<1x32xbf16>, vector<32x128xbf16>, vector<1x128xf32> -> vector<1x128xf32>
    %c0_21 = arith.constant 0 : index
    %c0_22 = arith.constant 0 : index
    %45 = vector.load %arg7[%c0_21, %c0_22] : memref<1x128xf32, #tpu.memory_space<vmem>>, vector<1x128xf32>
    %46 = arith.addf %44, %45 : vector<1x128xf32>
    %c0_23 = arith.constant 0 : index
    %c0_24 = arith.constant 0 : index
    %c0_25 = arith.constant 0 : index
    %47 = vector.load %arg8[%c0_23, %c0_24, %c0_25] : memref<1x1x128xf32, #tpu.memory_space<vmem>>, vector<1x1x128xf32>
    %48 = vector.shape_cast %47 : vector<1x1x128xf32> to vector<1x128xf32>
    %49 = vector.shape_cast %46 : vector<1x128xf32> to vector<1x1x128xf32>
    tpu.vector_store %arg8[%c0_23, %c0_24, %c0_25], %49 {strides = array<i32>} : memref<1x1x128xf32, #tpu.memory_space<vmem>>, vector<1x1x128xf32>,
    return
  }
  func.func @transform_0(%arg0: i32) -> (i32, i32, i32) {
    %c0_i32 = arith.constant 0 : i32
    %c0_i32_0 = arith.constant 0 : i32
    %c0_i32_1 = arith.constant 0 : i32
    return %arg0, %c0_i32, %c0_i32_0 : i32, i32, i32
  }
  func.func @transform_1(%arg0: i32) -> (i32, i32) {
    %c0_i32 = arith.constant 0 : i32
    %c0_i32_0 = arith.constant 0 : i32
    %c0_i32_1 = arith.constant 0 : i32
    return %c0_i32, %c0_i32_0 : i32, i32
  }
  func.func @transform_2(%arg0: i32) -> (i32, i32) {
    %c0_i32 = arith.constant 0 : i32
    %c0_i32_0 = arith.constant 0 : i32
    %c0_i32_1 = arith.constant 0 : i32
    return %c0_i32, %c0_i32_0 : i32, i32
  }
  func.func @transform_3(%arg0: i32) -> (i32, i32) {
    %c0_i32 = arith.constant 0 : i32
    %c0_i32_0 = arith.constant 0 : i32
    %c0_i32_1 = arith.constant 0 : i32
    return %c0_i32, %c0_i32_0 : i32, i32
  }
  func.func @transform_4(%arg0: i32) -> (i32, i32) {
    %c0_i32 = arith.constant 0 : i32
    %c0_i32_0 = arith.constant 0 : i32
    %c0_i32_1 = arith.constant 0 : i32
    return %c0_i32, %c0_i32_0 : i32, i32
  }
  func.func @transform_5(%arg0: i32) -> (i32, i32) {
    %c0_i32 = arith.constant 0 : i32
    %c0_i32_0 = arith.constant 0 : i32
    %c0_i32_1 = arith.constant 0 : i32
    return %c0_i32, %c0_i32_0 : i32, i32
  }
  func.func @transform_6(%arg0: i32) -> (i32, i32) {
    %c0_i32 = arith.constant 0 : i32
    %c0_i32_0 = arith.constant 0 : i32
    %c0_i32_1 = arith.constant 0 : i32
    return %c0_i32, %c0_i32_0 : i32, i32
  }
  func.func @transform_7(%arg0: i32) -> (i32, i32, i32) {
    %c0_i32 = arith.constant 0 : i32
    %c0_i32_0 = arith.constant 0 : i32
    %c0_i32_1 = arith.constant 0 : i32
    return %arg0, %c0_i32, %c0_i32_0 : i32, i32, i32
  }
}

</mosaic_0001>

<bundles_post_ra>
// kernel: absolute_cct_forward.9
= control target key start
LH: loop header
LB: loop body
LE: loop exit
PB: predicated region body
PF: predicated region fallthrough
CT: control target
= control target key end

     0   :  { %s787_s9 = smov 0   ;;  %s941_s0 = inlined_call_operand.vmem [shape: f32[400,36], index: 0, kind: input, shape index: {}]   ;;  %s942_s1 = inlined_call_operand.vmem [shape: bf16[36,32], index: 1, kind: input, shape index: {}]   ;;  %s943_s2 = inlined_call_operand.vmem [shape: bf16[400,32], index: 2, kind: output, shape index: {}]  }
   0x1 LB: > { %s594_s10 = sadd.s32 4294967295, %s768_s9   ;;  %p598_p0 = scmp.ge.s32.totalorder %s768_s9, 1  ;;  %s768_s9 = sphi %s787_s9, %s12_s9  }
   0x2   : > { %p113_p1 = scmp.lt.s32.totalorder %s768_s9, 3 }
   0x4   : > { %p114_p2 = pnand %p598_p0, %p113_p1 }
   0x5   : > { %v759_v0 = vld [vmem:[%s942_s1] sm:$0xff] (!%p114_p2)   ;;  %v770_v1 = vmov (!%p114_p2), 0.0   ;;  %v760_v2 = vld [vmem:[%s942_s1 + $0x8] sm:$0xff] (!%p114_p2)   ;;  %v761_v3 = vld [vmem:[%s942_s1 + $0x10] ss:$0 sps:$4 sm:$0x33] (!%p114_p2)  }
   0x6   : > { %117 = sbr.rel (%p114_p2) target bundleno = 286 (0x11e), region = 28  ;;  %685 = vmatprep.subr.bf16.mxu0 (!%p114_p2), %v770_v1  ;;  %743 = vmatprep.subr.bf16.mxu1 (!%p114_p2), %v770_v1  ;;  %vm246_vm0 = vcmask (!%p114_p2), 1041408   ;;  %vm771_vm1 = vmmov (!%p114_p2), 0   ;;  %vm206_vm2 = vcmask (!%p114_p2), 293888   ;;  %vm512_vm3 = vcmask (!%p114_p2), 257024  }
   0x7   : > { %686 = vmatpush3.bf16.msra.mxu0 (!%p114_p2), %v759_v0  ;;  %746 = vmatpush3.bf16.msra.mxu1 (!%p114_p2), %v759_v0  ;;  %s135_s17 = smul.u32 (!%p114_p2), 25, %s594_s10  ;;  %v248_v4 = vsel (!%p114_p2), %vm246_vm0, %v761_v3, 0 }
   0x8   : > { %687 = vmatprep.subr.bf16.mxu0 (!%p114_p2), %v770_v1  ;;  %744 = vmatprep.subr.bf16.mxu1 (!%p114_p2), %v770_v1 }
   0x9   : > { %691 = vmatprep.mubr.msk.bf16.mxu0 (!%p114_p2), %vm771_vm1, %v770_v1  ;;  %719 = vmatprep.mubr.msk.bf16.mxu1 (!%p114_p2), %vm771_vm1, %v770_v1  ;;  %p136_p3 = scmp.lt.s32.totalorder (!%p114_p2), %s135_s17, 49 }
   0xb   : > { %688 = vmatpush3.bf16.msra.mxu0 (!%p114_p2), %v760_v2  ;;  %747 = vmatpush3.bf16.msra.mxu1 (!%p114_p2), %v760_v2 }
   0xc   : > { %689 = vmatprep.subr.bf16.mxu0 (!%p114_p2), %v770_v1  ;;  %745 = vmatprep.subr.bf16.mxu1 (!%p114_p2), %v770_v1 }
   0xd   : > { %s945_s17 = smov (!%p136_p3, %s135_s17), 49 }
   0xe   : > { %s599_s18 = sshll.u32 %s945_s17, 3  ;;  %s600_s22 = sshll.u32 %s945_s17, 2 }
   0xf   : > { %690 = vmatpush3.bf16.msra.mxu0 %v248_v4  ;;  %s820_s21 = scalar_lea.vmem %s941_s0, %s599_s18  ;;  %748 = vmatpush3.bf16.msra.mxu1 %v248_v4  ;;  %s886_s25 = scalar_lea.vmem %s943_s2, %s600_s22 }
  0x10   : > { %v148_v5 = vld [vmem:[%s820_s21] sm:$0xff]  ;;  %v149_v6 = vld [vmem:[%s820_s21 + $0x8] sm:$0xff]  ;;  %v162_v7 = vld [vmem:[%s820_s21 + $0x70] sm:$0xff] }
  0x11   : > { %v173_v8 = vpack.c.bf16 %v149_v6, %v148_v5  ;;  %v163_v9 = vld [vmem:[%s820_s21 + $0x78] sm:$0xff]  ;;  %v150_v11 = vld [vmem:[%s820_s21 + $0x10] sm:$0xff]  ;;  %v164_v13 = vld [vmem:[%s820_s21 + $0x80] sm:$0xff] }
  0x12   : > { %v180_v10 = vpack.c.bf16 %v163_v9, %v162_v7  ;;  %v151_v12 = vld [vmem:[%s820_s21 + $0x18] sm:$0xff]  ;;  %v165_v14 = vld [vmem:[%s820_s21 + $0x88] sm:$0xff]  ;;  %v152_v17 = vld [vmem:[%s820_s21 + $0x20] sm:$0xff] }
  0x13   : > { %692 = vmatmul.mubr.msk.bf16.vlgmr.msra.gmra.mrb[0].mxu0 %vm206_vm2, %v173_v8  ;;  %v174_v15 = vpack.c.bf16 %v151_v12, %v150_v11  ;;  %v181_v16 = vpack.c.bf16 %v165_v14, %v164_v13  ;;  %v153_v18 = vld [vmem:[%s820_s21 + $0x28] sm:$0xff]  ;;  %v166_v19 = vld [vmem:[%s820_s21 + $0x90] sm:$0xff]  ;;  %v167_v20 = vld [vmem:[%s820_s21 + $0x98] sm:$0xff] }
  0x14   : > { %695 = vmatprep.mubr.msk.bf16.mxu0 %vm771_vm1, %v770_v1  ;;  %720 = vmatmul.mubr.msk.bf16.vlgmr.msra.gmra.mrb[0].mxu1 %vm206_vm2, %v180_v10  ;;  %v175_v21 = vpack.c.bf16 %v153_v18, %v152_v17  ;;  %v182_v22 = vpack.c.bf16 %v167_v20, %v166_v19  ;;  %v154_v23 = vld [vmem:[%s820_s21 + $0x30] sm:$0xff]  ;;  %v155_v24 = vld [vmem:[%s820_s21 + $0x38] sm:$0xff]  ;;  %v168_v25 = vld [vmem:[%s820_s21 + $0xa0] sm:$0xff] }
  0x15   : > { %723 = vmatprep.mubr.msk.bf16.mxu1 %vm771_vm1, %v770_v1  ;;  %v169_v26 = vld [vmem:[%s820_s21 + $0xa8] sm:$0xff]  ;;  %v176_v27 = vpack.c.bf16 %v155_v24, %v154_v23  ;;  %v156_v29 = vld [vmem:[%s820_s21 + $0x40] sm:$0xff]  ;;  %v170_v31 = vld [vmem:[%s820_s21 + $0xb0] sm:$0xff] }
  0x16   : > { %v183_v28 = vpack.c.bf16 %v169_v26, %v168_v25  ;;  %v157_v30 = vld [vmem:[%s820_s21 + $0x48] sm:$0xff]  ;;  %v171_v32 = vld [vmem:[%s820_s21 + $0xb8] sm:$0xff]  ;;  %v158_v35 = vld [vmem:[%s820_s21 + $0x50] sm:$0xff] }
  0x17   : > { %v177_v33 = vpack.c.bf16 %v157_v30, %v156_v29  ;;  %v184_v34 = vpack.c.bf16 %v171_v32, %v170_v31  ;;  %v159_v36 = vld [vmem:[%s820_s21 + $0x58] sm:$0xff]  ;;  %v172_v37 = vld [vmem:[%s820_s21 + $0xc0] sm:$0xff]  ;;  %v161_v41 = vld [vmem:[%s820_s21 + $0x68] sm:$0xff] }
  0x18   : > { %v178_v38 = vpack.c.bf16 %v159_v36, %v158_v35  ;;  %v185_v39 = vpack.c.bf16 %v172_v37, %v172_v37  ;;  %v160_v40 = vld [vmem:[%s820_s21 + $0x60] sm:$0xff] }
  0x19   : > { %v179_v42 = vpack.c.bf16 %v161_v41, %v160_v40 }
  0x1b   : > { %696 = vmatmul.mubr.msk.bf16.gmra.mrb[4].mxu0 %vm206_vm2, %v174_v15 }
  0x1c   : > { %699 = vmatprep.mubr.msk.bf16.mxu0 %vm771_vm1, %v770_v1  ;;  %724 = vmatmul.mubr.msk.bf16.gmra.mrb[4].mxu1 %vm206_vm2, %v181_v16 }
  0x1d   : > { %727 = vmatprep.mubr.msk.bf16.mxu1 %vm771_vm1, %v770_v1 }
  0x23   : > { %700 = vmatmul.mubr.msk.bf16.gmra.mrb[8].mxu0 %vm206_vm2, %v175_v21 }
  0x24   : > { %703 = vmatprep.mubr.msk.bf16.mxu0 %vm771_vm1, %v770_v1  ;;  %728 = vmatmul.mubr.msk.bf16.gmra.mrb[8].mxu1 %vm206_vm2, %v182_v22 }
  0x25   : > { %731 = vmatprep.mubr.msk.bf16.mxu1 %vm771_vm1, %v770_v1 }
  0x2b   : > { %704 = vmatmul.mubr.msk.bf16.gmra.mrb[12].mxu0 %vm206_vm2, %v176_v27 }
  0x2c   : > { %707 = vmatprep.mubr.msk.bf16.mxu0 %vm771_vm1, %v770_v1  ;;  %732 = vmatmul.mubr.msk.bf16.gmra.mrb[12].mxu1 %vm206_vm2, %v183_v28 }
  0x2d   : > { %735 = vmatprep.mubr.msk.bf16.mxu1 %vm771_vm1, %v770_v1 }
  0x33   : > { %708 = vmatmul.mubr.msk.bf16.gmra.mrb[16].mxu0 %vm206_vm2, %v177_v33 }
  0x34   : > { %711 = vmatprep.mubr.msk.bf16.mxu0 %vm771_vm1, %v770_v1  ;;  %736 = vmatmul.mubr.msk.bf16.gmra.mrb[16].mxu1 %vm206_vm2, %v184_v34 }
  0x35   : > { %739 = vmatprep.mubr.msk.bf16.mxu1 %vm771_vm1, %v770_v1 }
  0x3b   : > { %712 = vmatmul.mubr.msk.bf16.gmra.mrb[20].mxu0 %vm206_vm2, %v178_v38 }
  0x3c   : > { %715 = vmatprep.mubr.msk.bf16.mxu0 %vm771_vm1, %v770_v1  ;;  %740 = vmatmul.mubr.msk.bf16.gmra.mrb[20].mxu1 %vm206_vm2, %v185_v39 }
  0x43   : > { %716 = vmatmul.mubr.msk.bf16.gmra.mrb[24].mxu0 %vm206_vm2, %v179_v42 }
  0xe6   : > { %v284_v43 = vpop.f32.mrb[0].mxu0 }
  0xe7   : > { %v386_v44 = vmax.f32 %v284_v43, 0.0  ;;  %v693_v45 = vpop.f32.mrb[1].mxu0  ;;  %v340_v46 = vpop.f32.mrb[0].mxu1 }
  0xe8   : > { %v287_v47 = vpop.f32.mrb[2].mxu0  ;;  %v400_v48 = vmax.f32 %v340_v46, 0.0  ;;  %v721_v49 = vpop.f32.mrb[1].mxu1 }
  0xe9   : > { %v644_v50 = vpack.c.bf16 %v386_v44, %v386_v44  ;;  %v387_v51 = vmax.f32 %v287_v47, 0.0  ;;  %v694_v52 = vpop.f32.mrb[3].mxu0  ;;  %v343_v53 = vpop.f32.mrb[2].mxu1 }
  0xea   : > { %v658_v54 = vpack.c.bf16 %v400_v48, %v400_v48  ;;  %v401_v55 = vmax.f32 %v343_v53, 0.0  ;;  %v722_v56 = vpop.f32.mrb[3].mxu1 }
  0xeb   : > { %513 = vst.msk [vmem:[%s886_s25] sm:$0xf] %vm512_vm3, %v644_v50  ;;  %v645_v57 = vpack.c.bf16 %v387_v51, %v387_v51 }
  0xec   : > { %527 = vst.msk [vmem:[%s886_s25 + $0x38] sm:$0xf] %vm512_vm3, %v658_v54  ;;  %v659_v58 = vpack.c.bf16 %v401_v55, %v401_v55 }
  0xed   : > { %514 = vst.msk [vmem:[%s886_s25 + $0x4] sm:$0xf] %vm512_vm3, %v645_v57 }
  0xee   : > { %v292_v59 = vpop.f32.mrb[4].mxu0  ;;  %528 = vst.msk [vmem:[%s886_s25 + $0x3c] sm:$0xf] %vm512_vm3, %v659_v58 }
  0xef   : > { %v388_v60 = vmax.f32 %v292_v59, 0.0  ;;  %v697_v61 = vpop.f32.mrb[5].mxu0  ;;  %v348_v62 = vpop.f32.mrb[4].mxu1 }
  0xf0   : > { %v295_v63 = vpop.f32.mrb[6].mxu0  ;;  %v402_v0 = vmax.f32 %v348_v62, 0.0  ;;  %v725_v1 = vpop.f32.mrb[5].mxu1 }
  0xf1   : > { %v646_v2 = vpack.c.bf16 %v388_v60, %v388_v60  ;;  %v389_v3 = vmax.f32 %v295_v63, 0.0  ;;  %v698_v4 = vpop.f32.mrb[7].mxu0  ;;  %v351_v5 = vpop.f32.mrb[6].mxu1 }
  0xf2   : > { %v660_v6 = vpack.c.bf16 %v402_v0, %v402_v0  ;;  %v403_v7 = vmax.f32 %v351_v5, 0.0  ;;  %v726_v8 = vpop.f32.mrb[7].mxu1 }
  0xf3   : > { %515 = vst.msk [vmem:[%s886_s25 + $0x8] sm:$0xf] %vm512_vm3, %v646_v2  ;;  %v647_v9 = vpack.c.bf16 %v389_v3, %v389_v3 }
  0xf4   : > { %529 = vst.msk [vmem:[%s886_s25 + $0x40] sm:$0xf] %vm512_vm3, %v660_v6  ;;  %v661_v10 = vpack.c.bf16 %v403_v7, %v403_v7 }
  0xf5   : > { %516 = vst.msk [vmem:[%s886_s25 + $0xc] sm:$0xf] %vm512_vm3, %v647_v9 }
  0xf6   : > { %v300_v11 = vpop.f32.mrb[8].mxu0  ;;  %530 = vst.msk [vmem:[%s886_s25 + $0x44] sm:$0xf] %vm512_vm3, %v661_v10 }
  0xf7   : > { %v390_v12 = vmax.f32 %v300_v11, 0.0  ;;  %v701_v13 = vpop.f32.mrb[9].mxu0  ;;  %v356_v14 = vpop.f32.mrb[8].mxu1 }
  0xf8   : > { %v303_v15 = vpop.f32.mrb[10].mxu0  ;;  %v404_v16 = vmax.f32 %v356_v14, 0.0  ;;  %v729_v17 = vpop.f32.mrb[9].mxu1 }
  0xf9   : > { %v648_v18 = vpack.c.bf16 %v390_v12, %v390_v12  ;;  %v391_v19 = vmax.f32 %v303_v15, 0.0  ;;  %v702_v20 = vpop.f32.mrb[11].mxu0  ;;  %v359_v21 = vpop.f32.mrb[10].mxu1 }
  0xfa   : > { %v662_v22 = vpack.c.bf16 %v404_v16, %v404_v16  ;;  %v405_v23 = vmax.f32 %v359_v21, 0.0  ;;  %v730_v24 = vpop.f32.mrb[11].mxu1 }
  0xfb   : > { %517 = vst.msk [vmem:[%s886_s25 + $0x10] sm:$0xf] %vm512_vm3, %v648_v18  ;;  %v649_v25 = vpack.c.bf16 %v391_v19, %v391_v19 }
  0xfc   : > { %531 = vst.msk [vmem:[%s886_s25 + $0x48] sm:$0xf] %vm512_vm3, %v662_v22  ;;  %v663_v26 = vpack.c.bf16 %v405_v23, %v405_v23 }
  0xfd   : > { %518 = vst.msk [vmem:[%s886_s25 + $0x14] sm:$0xf] %vm512_vm3, %v649_v25 }
  0xfe   : > { %v308_v27 = vpop.f32.mrb[12].mxu0  ;;  %532 = vst.msk [vmem:[%s886_s25 + $0x4c] sm:$0xf] %vm512_vm3, %v663_v26 }
  0xff   : > { %v392_v28 = vmax.f32 %v308_v27, 0.0  ;;  %v705_v29 = vpop.f32.mrb[13].mxu0  ;;  %v364_v30 = vpop.f32.mrb[12].mxu1 }
 0x100   : > { %v311_v31 = vpop.f32.mrb[14].mxu0  ;;  %v406_v32 = vmax.f32 %v364_v30, 0.0  ;;  %v733_v33 = vpop.f32.mrb[13].mxu1 }
 0x101   : > { %v650_v34 = vpack.c.bf16 %v392_v28, %v392_v28  ;;  %v393_v35 = vmax.f32 %v311_v31, 0.0  ;;  %v706_v36 = vpop.f32.mrb[15].mxu0  ;;  %v367_v37 = vpop.f32.mrb[14].mxu1 }
 0x102   : > { %v664_v38 = vpack.c.bf16 %v406_v32, %v406_v32  ;;  %v407_v39 = vmax.f32 %v367_v37, 0.0  ;;  %v734_v40 = vpop.f32.mrb[15].mxu1 }
 0x103   : > { %519 = vst.msk [vmem:[%s886_s25 + $0x18] sm:$0xf] %vm512_vm3, %v650_v34  ;;  %v651_v41 = vpack.c.bf16 %v393_v35, %v393_v35 }
 0x104   : > { %533 = vst.msk [vmem:[%s886_s25 + $0x50] sm:$0xf] %vm512_vm3, %v664_v38  ;;  %v665_v42 = vpack.c.bf16 %v407_v39, %v407_v39 }
 0x105   : > { %520 = vst.msk [vmem:[%s886_s25 + $0x1c] sm:$0xf] %vm512_vm3, %v651_v41 }
 0x106   : > { %v316_v43 = vpop.f32.mrb[16].mxu0  ;;  %534 = vst.msk [vmem:[%s886_s25 + $0x54] sm:$0xf] %vm512_vm3, %v665_v42 }
 0x107   : > { %v394_v44 = vmax.f32 %v316_v43, 0.0  ;;  %v709_v45 = vpop.f32.mrb[17].mxu0  ;;  %v372_v46 = vpop.f32.mrb[16].mxu1 }
 0x108   : > { %v319_v47 = vpop.f32.mrb[18].mxu0  ;;  %v408_v48 = vmax.f32 %v372_v46, 0.0  ;;  %v737_v49 = vpop.f32.mrb[17].mxu1 }
 0x109   : > { %v652_v50 = vpack.c.bf16 %v394_v44, %v394_v44  ;;  %v395_v51 = vmax.f32 %v319_v47, 0.0  ;;  %v710_v52 = vpop.f32.mrb[19].mxu0  ;;  %v375_v53 = vpop.f32.mrb[18].mxu1 }
 0x10a   : > { %v666_v54 = vpack.c.bf16 %v408_v48, %v408_v48  ;;  %v409_v55 = vmax.f32 %v375_v53, 0.0  ;;  %v738_v56 = vpop.f32.mrb[19].mxu1 }
 0x10b   : > { %521 = vst.msk [vmem:[%s886_s25 + $0x20] sm:$0xf] %vm512_vm3, %v652_v50  ;;  %v653_v57 = vpack.c.bf16 %v395_v51, %v395_v51 }
 0x10c   : > { %535 = vst.msk [vmem:[%s886_s25 + $0x58] sm:$0xf] %vm512_vm3, %v666_v54  ;;  %v667_v58 = vpack.c.bf16 %v409_v55, %v409_v55 }
 0x10d   : > { %522 = vst.msk [vmem:[%s886_s25 + $0x24] sm:$0xf] %vm512_vm3, %v653_v57 }
 0x10e   : > { %v324_v59 = vpop.f32.mrb[20].mxu0  ;;  %536 = vst.msk [vmem:[%s886_s25 + $0x5c] sm:$0xf] %vm512_vm3, %v667_v58 }
 0x10f   : > { %v396_v60 = vmax.f32 %v324_v59, 0.0  ;;  %v713_v61 = vpop.f32.mrb[21].mxu0  ;;  %v380_v62 = vpop.f32.mrb[20].mxu1 }
 0x110   : > { %v327_v63 = vpop.f32.mrb[22].mxu0  ;;  %v410_v0 = vmax.f32 %v380_v62, 0.0  ;;  %v741_v1 = vpop.f32.mrb[21].mxu1 }
 0x111   : > { %v654_v2 = vpack.c.bf16 %v396_v60, %v396_v60  ;;  %v397_v3 = vmax.f32 %v327_v63, 0.0  ;;  %v714_v4 = vpop.f32.mrb[23].mxu0  ;;  %v383_v5 = vpop.f32.mrb[22].mxu1 }
 0x112   : > { %v668_v6 = vpack.c.bf16 %v410_v0, %v410_v0  ;;  %v742_v7 = vpop.f32.mrb[23].mxu1 }
 0x113   : > { %523 = vst.msk [vmem:[%s886_s25 + $0x28] sm:$0xf] %vm512_vm3, %v654_v2  ;;  %v655_v8 = vpack.c.bf16 %v397_v3, %v397_v3 }
 0x114   : > { %537 = vst.msk [vmem:[%s886_s25 + $0x60] sm:$0xf] %vm512_vm3, %v668_v6 }
 0x115   : > { %524 = vst.msk [vmem:[%s886_s25 + $0x2c] sm:$0xf] %vm512_vm3, %v655_v8 }
 0x116   : > { %v332_v9 = vpop.f32.mrb[24].mxu0 }
 0x117   : > { %v398_v10 = vmax.f32 %v332_v9, 0.0  ;;  %v717_v11 = vpop.f32.mrb[25].mxu0 }
 0x118   : > { %v335_v12 = vpop.f32.mrb[26].mxu0 }
 0x119   : > { %v656_v13 = vpack.c.bf16 %v398_v10, %v398_v10  ;;  %v399_v14 = vmax.f32 %v335_v12, 0.0  ;;  %v718_v15 = vpop.f32.mrb[27].mxu0 }
 0x11b   : > { %525 = vst.msk [vmem:[%s886_s25 + $0x30] sm:$0xf] %vm512_vm3, %v656_v13  ;;  %v657_v16 = vpack.c.bf16 %v399_v14, %v399_v14 }
 0x11d   : > { %526 = vst.msk [vmem:[%s886_s25 + $0x34] sm:$0xf] %vm512_vm3, %v657_v16 }
 0x11e PF: > { %s12_s9 = sadd.s32 1, %s768_s9  }
 0x11f   : > { %p9_p4 = scmp.ge.s32.totalorder %s12_s9, 4  }
 0x121   :  { %11 = sbr.rel (!%p9_p4) target bundleno = 1 (0x1), region = 58 }

// kernel: absolute_cct_forward.10
= control target key start
LH: loop header
LB: loop body
LE: loop exit
PB: predicated region body
PF: predicated region fallthrough
CT: control target
= control target key end

     0   :  { %s309_s9 = smov 0   ;;  %s356_s0 = inlined_call_operand.vmem [shape: bf16[2,9,16,32], index: 0, kind: input, shape index: {}]   ;;  %s357_s1 = inlined_call_operand.vmem [shape: f32[16,32], index: 1, kind: input, shape index: {}]   ;;  %s358_s2 = inlined_call_operand.vmem [shape: f32[2,16,32], index: 2, kind: output, shape index: {}]  }
   0x1 LB: > { %s250_s10 = sadd.s32 4294967295, %s292_s9   ;;  %p254_p0 = scmp.ge.s32.totalorder %s292_s9, 1  ;;  %s292_s9 = sphi %s309_s9, %s12_s9  }
   0x2   : > { %p112_p1 = scmp.lt.s32.totalorder %s292_s9, 3 }
   0x4   : > { %p113_p2 = pnand %p254_p0, %p112_p1 }
   0x5   : > { %p134_p3 = scmp.lt.s32.totalorder (!%p113_p2), %s250_s10, 1  ;;  %v188_v32 = vld [vmem:[%s357_s1] sm:$0xff] (!%p113_p2)  ;;  %vm192_vm0 = vcmask (!%p113_p2), 261120   ;;  %v189_v37 = vld [vmem:[%s357_s1 + $0x8] sm:$0xff] (!%p113_p2) }
   0x6   : > { %116 = sbr.rel (%p113_p2) target bundleno = 40 (0x28), region = 28 }
   0xd   : > { %s360_s10 = smov (!%p134_p3, %s250_s10), 1 }
   0xe   : > { %s277_s11 = smul.u32 72, %s360_s10  ;;  %s276_s15 = sshll.u32 %s360_s10, 4 }
   0xf   : > { %s143_s20 = scalar_lea.vmem %s358_s2, %s276_s15 }
  0x10   : > { %s323_s14 = scalar_lea.vmem %s356_s0, %s277_s11 }
  0x11   : > { %v144_v0 = vld [vmem:[%s323_s14] sm:$0xf]  ;;  %v258_v1 = vld [vmem:[%s323_s14 + $0x8] sm:$0xf]  ;;  %v260_v2 = vld [vmem:[%s323_s14 + $0x10] sm:$0xf] }
  0x12   : > { %v149_v3 = vmax.bf16 %v258_v1, %v144_v0  ;;  %v262_v4 = vld [vmem:[%s323_s14 + $0x18] sm:$0xf]  ;;  %v145_v6 = vld [vmem:[%s323_s14 + $0x4] sm:$0xf]  ;;  %v259_v7 = vld [vmem:[%s323_s14 + $0xc] sm:$0xf] }
  0x13   : > { %v261_v8 = vld [vmem:[%s323_s14 + $0x14] sm:$0xf]  ;;  %v264_v9 = vld [vmem:[%s323_s14 + $0x20] sm:$0xf]  ;;  %v150_v10 = vmax.bf16 %v259_v7, %v145_v6  ;;  %v263_v12 = vld [vmem:[%s323_s14 + $0x1c] sm:$0xf] }
  0x14   : > { %v154_v5 = vmax.bf16 %v260_v2, %v149_v3  ;;  %v266_v13 = vld [vmem:[%s323_s14 + $0x28] sm:$0xf]  ;;  %v265_v16 = vld [vmem:[%s323_s14 + $0x24] sm:$0xf]  ;;  %v268_v17 = vld [vmem:[%s323_s14 + $0x30] sm:$0xf] }
  0x15   : > { %v155_v14 = vmax.bf16 %v261_v8, %v150_v10  ;;  %v267_v20 = vld [vmem:[%s323_s14 + $0x2c] sm:$0xf]  ;;  %v270_v21 = vld [vmem:[%s323_s14 + $0x38] sm:$0xf]  ;;  %v269_v24 = vld [vmem:[%s323_s14 + $0x34] sm:$0xf] }
  0x16   : > { %v159_v11 = vmax.bf16 %v262_v4, %v154_v5  ;;  %v272_v25 = vld [vmem:[%s323_s14 + $0x40] sm:$0xf]  ;;  %v271_v28 = vld [vmem:[%s323_s14 + $0x3c] sm:$0xf]  ;;  %v273_v31 = vld [vmem:[%s323_s14 + $0x44] sm:$0xf] }
  0x17   : > { %v160_v18 = vmax.bf16 %v263_v12, %v155_v14 }
  0x18   : > { %v164_v15 = vmax.bf16 %v264_v9, %v159_v11 }
  0x19   : > { %v165_v22 = vmax.bf16 %v265_v16, %v160_v18 }
  0x1a   : > { %v169_v19 = vmax.bf16 %v266_v13, %v164_v15 }
  0x1b   : > { %v170_v26 = vmax.bf16 %v267_v20, %v165_v22 }
  0x1c   : > { %v174_v23 = vmax.bf16 %v268_v17, %v169_v19 }
  0x1d   : > { %v175_v29 = vmax.bf16 %v269_v24, %v170_v26 }
  0x1e   : > { %v179_v27 = vmax.bf16 %v270_v21, %v174_v23 }
  0x1f   : > { %v180_v33 = vmax.bf16 %v271_v28, %v175_v29 }
  0x20   : > { %v184_v30 = vmax.bf16 %v272_v25, %v179_v27 }
  0x21   : > { %v185_v35 = vmax.bf16 %v273_v31, %v180_v33 }
  0x22   : > { %v186_v34 = vunpack.c.l.bf16 %v184_v30 }
  0x23   : > { %v187_v38 = vunpack.c.l.bf16 %v185_v35 }
  0x24   : > { %v190_v36 = vadd.f32 %v188_v32, %v186_v34 }
  0x25   : > { %v191_v39 = vadd.f32 %v189_v37, %v187_v38 }
  0x26   : > { %193 = vst.msk [vmem:[%s143_s20] sm:$0xff] %vm192_vm0, %v190_v36 }
  0x27   : > { %194 = vst.msk [vmem:[%s143_s20 + $0x8] sm:$0xff] %vm192_vm0, %v191_v39 }
  0x28 PF: > { %s12_s9 = sadd.s32 1, %s292_s9  }
  0x29   : > { %p9_p4 = scmp.ge.s32.totalorder %s12_s9, 4  }
  0x2b   :  { %11 = sbr.rel (!%p9_p4) target bundleno = 1 (0x1), region = 66 }

// kernel: absolute_cct_forward.11
= control target key start
LH: loop header
LB: loop body
LE: loop exit
PB: predicated region body
PF: predicated region fallthrough
CT: control target
= control target key end

     0   :  { %s502_s18 = smov 0   ;;  %s543_s0 = inlined_call_operand.vmem [shape: f32[2,16,32], index: 0, kind: input, shape index: {}]   ;;  %s544_s1 = inlined_call_operand.vmem [shape: f32[1,32], index: 1, kind: input, shape index: {}]   ;;  %s545_s2 = inlined_call_operand.vmem [shape: f32[1,32], index: 2, kind: input, shape index: {}]   ;;  %s546_s3 = inlined_call_operand.vmem [shape: bf16[32,128], index: 3, kind: input, shape index: {}]   ;;  %s547_s4 = inlined_call_operand.vmem [shape: f32[1,128], index: 4, kind: input, shape index: {}]   ;;  %s548_s5 = inlined_call_operand.vmem [shape: bf16[2,16,128], index: 5, kind: output, shape index: {}]  }
   0x1 LB: > { %s407_s19 = sadd.s32 4294967295, %s468_s18   ;;  %p411_p0 = scmp.ge.s32.totalorder %s468_s18, 1  ;;  %s468_s18 = sphi %s502_s18, %s15_s18  }
   0x2   : > { %p187_p1 = scmp.lt.s32.totalorder %s468_s18, 3 }
   0x4   : > { %p188_p2 = pnand %p411_p0, %p187_p1 }
   0x5   : > { %p215_p3 = scmp.lt.s32.totalorder (!%p188_p2), %s407_s19, 1  ;;  %vm230_vm0 = vcmask (!%p188_p2), 261120   ;;  %v456_v14 = vld [vmem:[%s546_s3] sm:$0xff] (!%p188_p2)   ;;  %v470_v15 = vmov (!%p188_p2), 0.0   ;;  %v457_v16 = vld [vmem:[%s546_s3 + $0x8] sm:$0xff] (!%p188_p2)   ;;  %vm471_vm1 = vmmov (!%p188_p2), 0  }
   0x6   : > { %191 = sbr.rel (%p188_p2) target bundleno = 555 (0x22b), region = 40  ;;  %438 = vmatprep.subr.bf16.mxu0 (!%p188_p2), %v470_v15  ;;  %442 = vmatprep.mubr.msk.bf16.mxu0 (!%p188_p2), %vm471_vm1, %v470_v15  ;;  %v416_v25 = vld [vmem:[%s544_s1] ss:$0 sm:$0xff] (!%p188_p2) }
   0x7   : > { %439 = vmatpush3.bf16.msra.mxu0 (!%p188_p2), %v456_v14  ;;  %v417_v29 = vld [vmem:[%s545_s2] ss:$0 sm:$0xff] (!%p188_p2) }
   0x8   : > { %440 = vmatprep.subr.bf16.mxu0 (!%p188_p2), %v470_v15  ;;  %v418_v34 = vld [vmem:[%s547_s4] ss:$0 sm:$0xff] (!%p188_p2) }
   0xb   : > { %441 = vmatpush3.bf16.msra.mxu0 (!%p188_p2), %v457_v16 }
   0xd   : > { %s550_s19 = smov (!%p215_p3, %s407_s19), 1 }
   0xe   : > { %s426_s20 = sshll.u32 %s550_s19, 4  ;;  %s427_s9 = sshll.u32 %s550_s19, 3 }
   0xf   : > { %s219_s23 = scalar_lea.vmem %s543_s0, %s426_s20  ;;  %s224_s12 = scalar_lea.vmem %s548_s5, %s427_s9 }
  0x10   : > { %v226_v0 = vld [vmem:[%s219_s23] sm:$0xff]  ;;  %v227_v1 = vld [vmem:[%s219_s23 + $0x8] sm:$0xff] }
  0x11   : > { %v231_v2 = vsel %vm230_vm0, %v226_v0, 0.0  ;;  %v234_v3 = vsel %vm230_vm0, %v227_v1, 0.0 }
  0x12   : > { %232 = vadd.xlane.f32.xlu0 %v231_v2 }
  0x16   : > { %235 = vadd.xlane.f32.xlu0 %v234_v3 }
  0x9f   : > { %v233_v4 = vpop.xlane.xlu0 %232 }
  0xa0   : > { %v238_v5 = vmul.f32 0.03125, %v233_v4 }
  0xa2   : > { %v240_v6 = vsub.f32 %v226_v0, %v238_v5 }
  0xa3   : > { %v236_v7 = vpop.xlane.xlu0 %235 }
  0xa4   : > { %v239_v8 = vmul.f32 0.03125, %v236_v7  ;;  %v242_v9 = vmul.f32 %v240_v6, %v240_v6 }
  0xa6   : > { %v241_v10 = vsub.f32 %v227_v1, %v239_v8  ;;  %v244_v11 = vsel %vm230_vm0, %v242_v9, 0.0 }
  0xa7   : > { %245 = vadd.xlane.f32.xlu1 %v244_v11 }
  0xa8   : > { %v243_v12 = vmul.f32 %v241_v10, %v241_v10 }
  0xaa   : > { %v247_v13 = vsel %vm230_vm0, %v243_v12, 0.0 }
  0xab   : > { %248 = vadd.xlane.f32.xlu1 %v247_v13 }
 0x134   : > { %v246_v17 = vpop.xlane.xlu1 %245 }
 0x135   : > { %v250_v18 = vmul.f32 0.03125, %v246_v17 }
 0x137   : > { %v252_v19 = vadd.f32 1e-05, %v250_v18 }
 0x138   : > { %v249_v20 = vpop.xlane.xlu1 %248 }
 0x139   : > { %458 = vrsqrt.f32 %v252_v19  ;;  %v251_v21 = vmul.f32 0.03125, %v249_v20 }
 0x13b   : > { %v253_v22 = vadd.f32 1e-05, %v251_v21 }
 0x13d   : > { %460 = vrsqrt.f32 %v253_v22 }
 0x143   : > { %v459_v23 = vpop.eup %458 }
 0x144   : > { %v256_v24 = vmul.f32 %v459_v23, %v240_v6 }
 0x146   : > { %v264_v28 = vmul.f32 %v416_v25, %v256_v24 }
 0x147   : > { %v461_v26 = vpop.eup %460 }
 0x148   : > { %v257_v27 = vmul.f32 %v461_v26, %v241_v10  ;;  %v272_v31 = vadd.f32 %v417_v29, %v264_v28 }
 0x14a   : > { %v265_v30 = vmul.f32 %v416_v25, %v257_v27 }
 0x14c   : > { %v273_v32 = vadd.f32 %v417_v29, %v265_v30 }
 0x14e   : > { %v274_v33 = vpack.c.bf16 %v273_v32, %v272_v31 }
 0x150   : > { %443 = vmatmul.mubr.msk.bf16.vlgmr.msra.gmra.mrb[0].mxu0 %vm230_vm0, %v274_v33 }
 0x223   : > { %v335_v35 = vpop.f32.mrb[0].mxu0 }
 0x224   : > { %v444_v36 = vpop.f32.mrb[1].mxu0  ;;  %v336_v38 = vadd.f32 %v418_v34, %v335_v35 }
 0x225   : > { %v338_v37 = vpop.f32.mrb[2].mxu0 }
 0x226   : > { %v339_v39 = vadd.f32 %v418_v34, %v338_v37  ;;  %v445_v40 = vpop.f32.mrb[3].mxu0 }
 0x228   : > { %v433_v41 = vpack.c.bf16 %v339_v39, %v336_v38 }
 0x22a   : > { %434 = vst [vmem:[%s224_s12] sm:$0xff] %v433_v41  }
 0x22b PF: > { %s15_s18 = sadd.s32 1, %s468_s18  }
 0x22c   : > { %p12_p4 = scmp.ge.s32.totalorder %s15_s18, 4  }
 0x22e   :  { %14 = sbr.rel (!%p12_p4) target bundleno = 1 (0x1), region = 70 }

// kernel: absolute_cct_forward.12
= control target key start
LH: loop header
LB: loop body
LE: loop exit
PB: predicated region body
PF: predicated region fallthrough
CT: control target
= control target key end

     0   :  { %s774_s15 = smov 0   ;;  %s850_s0 = inlined_call_operand.vmem [shape: bf16[2,16,128], index: 0, kind: input, shape index: {}]   ;;  %s851_s1 = inlined_call_operand.vmem [shape: bf16[32,32], index: 1, kind: input, shape index: {}]   ;;  %s852_s2 = inlined_call_operand.vmem [shape: f32[1,32], index: 2, kind: input, shape index: {}]   ;;  %s853_s3 = inlined_call_operand.vmem [shape: f32[2,16,32], index: 3, kind: input, shape index: {}]   ;;  %s854_s4 = inlined_call_operand.vmem [shape: f32[2,16,32], index: 4, kind: output, shape index: {}]  }
   0x1 LB: > { %s625_s16 = sadd.s32 4294967295, %s739_s15   ;;  %p629_p0 = scmp.ge.s32.totalorder %s739_s15, 1  ;;  %s739_s15 = sphi %s774_s15, %s14_s15  }
   0x2   : > { %p172_p1 = scmp.lt.s32.totalorder %s739_s15, 3 }
   0x4   : > { %p173_p2 = pnand %p629_p0, %p172_p1 }
   0x5   : > { %p203_p3 = scmp.lt.s32.totalorder (!%p173_p2), %s625_s16, 1  ;;  %v741_v0 = vmov (!%p173_p2), 0.0   ;;  %vm742_vm0 = vmmov (!%p173_p2), 0   ;;  %s743_s21 = smov (!%p173_p2), 96   ;;  %vm228_vm1 = vcmask (!%p173_p2), 130048   ;;  %v715_v63 = vld [vmem:[%s851_s1] sm:$0xff] (!%p173_p2)  }
   0x6   : > { %176 = sbr.rel (%p173_p2) target bundleno = 1771 (0x6eb), region = 36  ;;  %661 = vmatprep.subr.bf16.mxu0 (!%p173_p2), %v741_v0  ;;  %663 = vmatprep.mubr.msk.bf16.mxu0 (!%p173_p2), %vm742_vm0, %v741_v0  ;;  %s744_s22 = smov (!%p173_p2), 64   ;;  %vm498_vm2 = vcmask (!%p173_p2), 261120  }
   0x7   : > { %667 = vmatprep.subr.bf16.mxu1 (!%p173_p2), %v741_v0  ;;  %669 = vmatprep.mubr.msk.bf16.mxu1 (!%p173_p2), %vm742_vm0, %v741_v0  ;;  %s745_s23 = smov (!%p173_p2), 80   ;;  %s746_s24 = smov (!%p173_p2), 112  }
   0x8   : > { %s747_s25 = smov (!%p173_p2), 48   ;;  %s748_s30 = smov (!%p173_p2), 16  }
   0xd   : > { %s856_s16 = smov (!%p203_p3, %s625_s16), 1 }
   0xe   : > { %s647_s17 = sshll.u32 %s856_s16, 3  ;;  %s648_s5 = sshll.u32 %s856_s16, 4 }
   0xf   : > { %s207_s20 = scalar_lea.vmem %s850_s0, %s647_s17  ;;  %s212_s8 = scalar_lea.vmem %s853_s3, %s648_s5 }
  0x10   : > { %v794_v1 = vld [vmem:[%s207_s20] sm:$0xff]   ;;  %s217_s13 = scalar_lea.vmem %s854_s4, %s648_s5 }
  0x11   : > { %226 = vrot.lane.b32.xlu0 %v794_v1, %s743_s21 }
  0x83   : > { %v227_v2 = vpop.permute.xlu0 %226 }
  0x84   : > { %v233_v3 = vsel %vm228_vm1, %v227_v2, 0 }
  0x85   : > { %662 = vmatpush3.bf16.xpose.msra.mxu0 %v233_v3 }
  0x86   : > { %679 = vmatprep.subr.bf16.mxu0 %v741_v0 }
  0x8c   : > { %664 = vmatmul.mubr.msk.bf16.vlgmr.msra.gmra.mrb[0].mxu0 %vm228_vm1, %v794_v1 }
  0x8d   : > { %681 = vmatprep.mubr.msk.bf16.mxu0 %vm742_vm0, %v741_v0 }
 0x15f   : > { %v269_v4 = vpop.f32.mrb[0].mxu0 }
 0x160   : > { %v276_v5 = vmul.f32 0.25, %v269_v4  ;;  %v665_v6 = vpop.f32.mrb[1].mxu0 }
 0x161   : > { %v272_v7 = vpop.f32.mrb[2].mxu0 }
 0x162   : > { %v277_v8 = vmul.f32 0.25, %v272_v7  ;;  %v666_v9 = vpop.f32.mrb[3].mxu0  ;;  %v278_v10 = vsel %vm228_vm1, %v276_v5, -inf }
 0x163   : > { %279 = vmax.xlane.f32.xlu0 %v278_v10 }
 0x164   : > { %v281_v11 = vsel %vm228_vm1, %v277_v8, -inf }
 0x165   : > { %282 = vmax.xlane.f32.xlu1 %v281_v11 }
 0x176   : > { %301 = vrot.lane.b32.xlu1 %v794_v1, %s744_s22 }
 0x1f0   : > { %v280_v12 = vpop.xlane.xlu0 %279 }
 0x1f1   : > { %v284_v13 = vsub.f32 %v276_v5, %v280_v12  ;;  %v543_v12 = vld [vmem:[%s212_s8] sm:$0xff] }
 0x1f2   : > { %v283_v14 = vpop.xlane.xlu1 %282 }
 0x1f3   : > { %v286_v15 = vmul.f32 1.442695, %v284_v13  ;;  %v285_v16 = vsub.f32 %v277_v8, %v283_v14  ;;  %v644_v14 = vld [vmem:[%s852_s2] ss:$0 sm:$0xff] }
 0x1f5   : > { %717 = vpow2.f32 %v286_v15  ;;  %v288_v17 = vmul.f32 1.442695, %v285_v16  ;;  %v544_v15 = vld [vmem:[%s212_s8 + $0x8] sm:$0xff] }
 0x1f6   : > { %v302_v18 = vpop.permute.xlu1 %301 }
 0x1f7   : > { %719 = vpow2.f32 %v288_v17  ;;  %668 = vmatpush3.bf16.msra.mxu1 %v302_v18 }
 0x1f8   : > { %673 = vmatprep.subr.bf16.mxu1 %v741_v0 }
 0x1ff   : > { %v718_v19 = vpop.eup %717 }
 0x200   : > { %v290_v20 = vsel %vm228_vm1, %v718_v19, 0.0 }
 0x201   : > { %v720_v21 = vpop.eup %719  ;;  %291 = vadd.xlane.f32.xlu1 %v290_v20 }
 0x202   : > { %v293_v22 = vsel %vm228_vm1, %v720_v21, 0.0 }
 0x205   : > { %294 = vadd.xlane.f32.xlu1 %v293_v22 }
 0x216   : > { %350 = vrot.lane.b32.xlu1 %v794_v1, %s745_s23 }
 0x21a   : > { %348 = vrot.lane.b32.xlu1 %v794_v1, %s746_s24 }
 0x28e   : > { %v292_v23 = vpop.xlane.xlu1 %291 }
 0x28f   : > { %721 = vrcp.f32 %v292_v23 }
 0x292   : > { %v295_v24 = vpop.xlane.xlu1 %294 }
 0x293   : > { %723 = vrcp.f32 %v295_v24 }
 0x296   : > { %v351_v27 = vpop.permute.xlu1 %350 }
 0x297   : > { %v356_v30 = vsel %vm228_vm1, %v351_v27, 0 }
 0x299   : > { %v722_v25 = vpop.eup %721 }
 0x29a   : > { %v298_v28 = vmul.f32 %v722_v25, %v718_v19  ;;  %v349_v32 = vpop.permute.xlu1 %348 }
 0x29d   : > { %v724_v26 = vpop.eup %723 }
 0x29e   : > { %v299_v29 = vmul.f32 %v724_v26, %v720_v21 }
 0x2a0   : > { %v300_v31 = vpack.c.bf16 %v299_v29, %v298_v28 }
 0x2a2   : > { %670 = vmatmul.mubr.msk.bf16.vlgmr.msra.gmra.mrb[0].mxu1 %vm228_vm1, %v300_v31 }
 0x2a3   : > { %674 = vmatpush3.bf16.xpose.msra.mxu1 %v356_v30  ;;  %675 = vmatprep.mubr.msk.bf16.mxu1 %vm742_vm0, %v741_v0 }
 0x2a4   : > { %685 = vmatprep.subr.bf16.mxu1 %v741_v0 }
 0x2aa   : > { %676 = vmatmul.mubr.msk.bf16.vlgmr.msra.gmra.mrb[4].mxu1 %vm228_vm1, %v349_v32 }
 0x2ab   : > { %689 = vmatprep.mubr.msk.bf16.mxu1 %vm742_vm0, %v741_v0  ;;  %686 = vmatpush3.bf16.msra.mxu1 %v715_v63 }
 0x2ac   : > { %687 = vmatprep.subr.bf16.mxu1 %v741_v0 }
 0x375   : > { %v341_v33 = vpop.f32.mrb[0].mxu1 }
 0x376   : > { %v671_v34 = vpop.f32.mrb[1].mxu1 }
 0x377   : > { %v344_v35 = vpop.f32.mrb[2].mxu1 }
 0x378   : > { %v672_v36 = vpop.f32.mrb[3].mxu1 }
 0x37d   : > { %v392_v37 = vpop.f32.mrb[4].mxu1 }
 0x37e   : > { %v399_v38 = vmul.f32 0.25, %v392_v37  ;;  %v677_v39 = vpop.f32.mrb[5].mxu1 }
 0x37f   : > { %v395_v40 = vpop.f32.mrb[6].mxu1 }
 0x380   : > { %v400_v41 = vmul.f32 0.25, %v395_v40  ;;  %v678_v42 = vpop.f32.mrb[7].mxu1  ;;  %v401_v43 = vsel %vm228_vm1, %v399_v38, -inf }
 0x381   : > { %402 = vmax.xlane.f32.xlu0 %v401_v43 }
 0x382   : > { %v404_v44 = vsel %vm228_vm1, %v400_v41, -inf }
 0x383   : > { %405 = vmax.xlane.f32.xlu1 %v404_v44 }
 0x40e   : > { %v403_v45 = vpop.xlane.xlu0 %402 }
 0x40f   : > { %v407_v46 = vsub.f32 %v399_v38, %v403_v45 }
 0x410   : > { %v406_v47 = vpop.xlane.xlu1 %405 }
 0x411   : > { %v409_v48 = vmul.f32 1.442695, %v407_v46  ;;  %v408_v49 = vsub.f32 %v400_v41, %v406_v47 }
 0x413   : > { %725 = vpow2.f32 %v409_v48  ;;  %v411_v50 = vmul.f32 1.442695, %v408_v49 }
 0x415   : > { %727 = vpow2.f32 %v411_v50 }
 0x41d   : > { %v726_v51 = vpop.eup %725 }
 0x41e   : > { %v413_v52 = vsel %vm228_vm1, %v726_v51, 0.0 }
 0x41f   : > { %v728_v53 = vpop.eup %727  ;;  %414 = vadd.xlane.f32.xlu0 %v413_v52 }
 0x420   : > { %v416_v54 = vsel %vm228_vm1, %v728_v53, 0.0 }
 0x423   : > { %417 = vadd.xlane.f32.xlu0 %v416_v54 }
 0x439   : > { %424 = vrot.lane.b32.xlu0 %v794_v1, %s747_s25  ;;  %v716_v1 = vld [vmem:[%s851_s1 + $0x8] sm:$0xff]  }
 0x43a   : > { %688 = vmatpush3.bf16.msra.mxu1 %v716_v1 }
 0x4ac   : > { %v415_v55 = vpop.xlane.xlu0 %414 }
 0x4ad   : > { %729 = vrcp.f32 %v415_v55 }
 0x4b0   : > { %v418_v56 = vpop.xlane.xlu0 %417 }
 0x4b1   : > { %731 = vrcp.f32 %v418_v56 }
 0x4b4   : > { %v425_v57 = vpop.permute.xlu0 %424 }
 0x4b5   : > { %680 = vmatpush3.bf16.msra.mxu0 %v425_v57 }
 0x4b7   : > { %v730_v58 = vpop.eup %729 }
 0x4b8   : > { %v421_v60 = vmul.f32 %v730_v58, %v726_v51 }
 0x4bb   : > { %v732_v59 = vpop.eup %731 }
 0x4bc   : > { %v422_v61 = vmul.f32 %v732_v59, %v728_v53 }
 0x4be   : > { %v423_v62 = vpack.c.bf16 %v422_v61, %v421_v60 }
 0x4c0   : > { %682 = vmatmul.mubr.msk.bf16.vlgmr.msra.gmra.mrb[4].mxu0 %vm228_vm1, %v423_v62 }
 0x593   : > { %v464_v2 = vpop.f32.mrb[4].mxu0 }
 0x594   : > { %v683_v3 = vpop.f32.mrb[5].mxu0 }
 0x595   : > { %v467_v4 = vpop.f32.mrb[6].mxu0 }
 0x596   : > { %v709_v5 = vpack.i.bf16 %v467_v4, %v464_v2  ;;  %v684_v6 = vpop.f32.mrb[7].mxu0 }
 0x598   : > { %710 = vrot.lane.b32.xlu0 %v709_v5, %s748_s30 }
 0x60a   : > { %v711_v7 = vpop.permute.xlu0 %710 }
 0x60b   : > { %v713_v8 = vunpack.i.h.bf16 %v711_v7  ;;  %v712_v9 = vunpack.i.l.bf16 %v711_v7 }
 0x60d   : > { %v480_v10 = vsel %vm228_vm1, %v344_v35, %v713_v8  ;;  %v479_v0 = vsel %vm228_vm1, %v341_v33, %v712_v9 }
 0x60e   : > { %v481_v11 = vpack.c.bf16 %v480_v10, %v479_v0 }
 0x610   : > { %690 = vmatmul.mubr.msk.bf16.vlgmr.msra.gmra.mrb[8].mxu1 %vm498_vm2, %v481_v11 }
 0x6e3   : > { %v536_v13 = vpop.f32.mrb[8].mxu1 }
 0x6e4   : > { %v545_v16 = vadd.f32 %v543_v12, %v536_v13  ;;  %v691_v17 = vpop.f32.mrb[9].mxu1 }
 0x6e5   : > { %v539_v18 = vpop.f32.mrb[10].mxu1 }
 0x6e6   : > { %v554_v19 = vadd.f32 %v644_v14, %v545_v16  ;;  %v546_v20 = vadd.f32 %v544_v15, %v539_v18  ;;  %v692_v21 = vpop.f32.mrb[11].mxu1 }
 0x6e8   : > { %556 = vst.msk [vmem:[%s217_s13] sm:$0xff] %vm498_vm2, %v554_v19  ;;  %v555_v22 = vadd.f32 %v644_v14, %v546_v20 }
 0x6ea   : > { %557 = vst.msk [vmem:[%s217_s13 + $0x8] sm:$0xff] %vm498_vm2, %v555_v22 }
 0x6eb PF: > { %s14_s15 = sadd.s32 1, %s739_s15  }
 0x6ec   : > { %p11_p4 = scmp.ge.s32.totalorder %s14_s15, 4  }
 0x6ee   :  { %13 = sbr.rel (!%p11_p4) target bundleno = 1 (0x1), region = 69 }

// kernel: absolute_cct_forward.13
= control target key start
LH: loop header
LB: loop body
LE: loop exit
PB: predicated region body
PF: predicated region fallthrough
CT: control target
= control target key end

     0   :  { %s687_s24 = smov 0   ;;  %s758_s0 = inlined_call_operand.vmem [shape: f32[2,16,32], index: 0, kind: input, shape index: {}]   ;;  %s759_s1 = inlined_call_operand.vmem [shape: f32[1,32], index: 1, kind: input, shape index: {}]   ;;  %s760_s2 = inlined_call_operand.vmem [shape: f32[1,32], index: 2, kind: input, shape index: {}]   ;;  %s761_s3 = inlined_call_operand.vmem [shape: bf16[32,64], index: 3, kind: input, shape index: {}]   ;;  %s762_s4 = inlined_call_operand.vmem [shape: f32[1,64], index: 4, kind: input, shape index: {}]   ;;  %s763_s5 = inlined_call_operand.vmem [shape: bf16[64,32], index: 5, kind: input, shape index: {}]   ;;  %s764_s6 = inlined_call_operand.vmem [shape: f32[1,32], index: 6, kind: input, shape index: {}]   ;;  %s765_s7 = inlined_call_operand.vmem [shape: f32[2,16,32], index: 7, kind: output, shape index: {}]  }
   0x1 LB: > { %s560_s25 = sadd.s32 4294967295, %s643_s24   ;;  %p564_p0 = scmp.ge.s32.totalorder %s643_s24, 1  ;;  %s643_s24 = sphi %s687_s24, %s17_s24  }
   0x2   : > { %p237_p1 = scmp.lt.s32.totalorder %s643_s24, 3 }
   0x4   : > { %p238_p2 = pnand %p564_p0, %p237_p1 }
   0x5   : > { %p269_p3 = scmp.lt.s32.totalorder (!%p238_p2), %s560_s25, 1  ;;  %vm284_vm0 = vcmask (!%p238_p2), 261120   ;;  %v623_v14 = vld [vmem:[%s761_s3] sm:$0xff] (!%p238_p2)   ;;  %v645_v15 = vmov (!%p238_p2), 0.0   ;;  %v624_v16 = vld [vmem:[%s761_s3 + $0x8] sm:$0xff] (!%p238_p2)   ;;  %vm646_vm1 = vmmov (!%p238_p2), 0  }
   0x6   : > { %241 = sbr.rel (%p238_p2) target bundleno = 800 (0x320), region = 48  ;;  %593 = vmatprep.subr.bf16.mxu0 (!%p238_p2), %v645_v15  ;;  %601 = vmatprep.subr.bf16.mxu1 (!%p238_p2), %v645_v15  ;;  %v569_v25 = vld [vmem:[%s759_s1] ss:$0 sm:$0xff] (!%p238_p2)  ;;  %v626_v35 = vld [vmem:[%s763_s5 + $0x8] sm:$0xff] (!%p238_p2)   ;;  %v627_v36 = vld [vmem:[%s763_s5 + $0x10] sm:$0xff] (!%p238_p2)   ;;  %vm447_vm2 = vcmask (!%p238_p2), 523264  }
   0x7   : > { %594 = vmatpush3.bf16.msra.mxu0 (!%p238_p2), %v623_v14  ;;  %597 = vmatprep.mubr.msk.bf16.mxu0 (!%p238_p2), %vm646_vm1, %v645_v15  ;;  %v570_v29 = vld [vmem:[%s760_s2] ss:$0 sm:$0xff] (!%p238_p2)  ;;  %v628_v37 = vld [vmem:[%s763_s5 + $0x18] sm:$0xff] (!%p238_p2)  }
   0x8   : > { %595 = vmatprep.subr.bf16.mxu0 (!%p238_p2), %v645_v15  ;;  %609 = vmatprep.mubr.msk.bf16.mxu1 (!%p238_p2), %vm646_vm1, %v645_v15  ;;  %v625_v34 = vld [vmem:[%s763_s5] sm:$0xff] (!%p238_p2)  }
   0x9   : > { %602 = vmatpush3.bf16.msra.mxu1 (!%p238_p2), %v625_v34  ;;  %v571_v38 = vld [vmem:[%s762_s4] ss:$0 sm:$0xff] (!%p238_p2) }
   0xa   : > { %603 = vmatprep.subr.bf16.mxu1 (!%p238_p2), %v645_v15 }
   0xb   : > { %596 = vmatpush3.bf16.msra.mxu0 (!%p238_p2), %v624_v16 }
   0xd   : > { %s767_s25 = smov (!%p269_p3, %s560_s25), 1  ;;  %604 = vmatpush3.bf16.msra.mxu1 %v626_v35 }
   0xe   : > { %s583_s26 = sshll.u32 %s767_s25, 4  ;;  %605 = vmatprep.subr.bf16.mxu1 %v645_v15 }
   0xf   : > { %s273_s29 = scalar_lea.vmem %s758_s0, %s583_s26  ;;  %s278_s9 = scalar_lea.vmem %s765_s7, %s583_s26 }
  0x10   : > { %v703_v0 = vld [vmem:[%s273_s29] sm:$0xff]  ;;  %v705_v1 = vld [vmem:[%s273_s29 + $0x8] sm:$0xff] }
  0x11   : > { %v285_v2 = vsel %vm284_vm0, %v703_v0, 0.0  ;;  %v288_v3 = vsel %vm284_vm0, %v705_v1, 0.0  ;;  %606 = vmatpush3.bf16.msra.mxu1 %v627_v36 }
  0x12   : > { %286 = vadd.xlane.f32.xlu0 %v285_v2  ;;  %607 = vmatprep.subr.bf16.mxu1 %v645_v15 }
  0x15   : > { %608 = vmatpush3.bf16.msra.mxu1 %v628_v37 }
  0x16   : > { %289 = vadd.xlane.f32.xlu0 %v288_v3  ;;  %v580_v3 = vld [vmem:[%s764_s6] ss:$0 sm:$0xff] }
  0x9f   : > { %v287_v4 = vpop.xlane.xlu0 %286 }
  0xa0   : > { %v292_v5 = vmul.f32 0.03125, %v287_v4 }
  0xa2   : > { %v294_v6 = vsub.f32 %v703_v0, %v292_v5 }
  0xa3   : > { %v290_v7 = vpop.xlane.xlu0 %289 }
  0xa4   : > { %v293_v8 = vmul.f32 0.03125, %v290_v7  ;;  %v296_v9 = vmul.f32 %v294_v6, %v294_v6 }
  0xa6   : > { %v295_v10 = vsub.f32 %v705_v1, %v293_v8  ;;  %v298_v11 = vsel %vm284_vm0, %v296_v9, 0.0 }
  0xa7   : > { %299 = vadd.xlane.f32.xlu1 %v298_v11 }
  0xa8   : > { %v297_v12 = vmul.f32 %v295_v10, %v295_v10 }
  0xaa   : > { %v301_v13 = vsel %vm284_vm0, %v297_v12, 0.0 }
  0xab   : > { %302 = vadd.xlane.f32.xlu1 %v301_v13 }
 0x134   : > { %v300_v17 = vpop.xlane.xlu1 %299 }
 0x135   : > { %v304_v18 = vmul.f32 0.03125, %v300_v17 }
 0x137   : > { %v306_v19 = vadd.f32 1e-05, %v304_v18 }
 0x138   : > { %v303_v20 = vpop.xlane.xlu1 %302 }
 0x139   : > { %629 = vrsqrt.f32 %v306_v19  ;;  %v305_v21 = vmul.f32 0.03125, %v303_v20 }
 0x13b   : > { %v307_v22 = vadd.f32 1e-05, %v305_v21 }
 0x13d   : > { %631 = vrsqrt.f32 %v307_v22 }
 0x143   : > { %v630_v23 = vpop.eup %629 }
 0x144   : > { %v310_v24 = vmul.f32 %v630_v23, %v294_v6 }
 0x146   : > { %v318_v28 = vmul.f32 %v569_v25, %v310_v24 }
 0x147   : > { %v632_v26 = vpop.eup %631 }
 0x148   : > { %v311_v27 = vmul.f32 %v632_v26, %v295_v10  ;;  %v326_v31 = vadd.f32 %v570_v29, %v318_v28 }
 0x14a   : > { %v319_v30 = vmul.f32 %v569_v25, %v311_v27 }
 0x14c   : > { %v327_v32 = vadd.f32 %v570_v29, %v319_v30 }
 0x14e   : > { %v328_v33 = vpack.c.bf16 %v327_v32, %v326_v31 }
 0x150   : > { %598 = vmatmul.mubr.msk.bf16.vlgmr.msra.gmra.mrb[0].mxu0 %vm284_vm0, %v328_v33 }
 0x223   : > { %v389_v39 = vpop.f32.mrb[0].mxu0 }
 0x224   : > { %v390_v40 = vadd.f32 %v571_v38, %v389_v39  ;;  %v599_v41 = vpop.f32.mrb[1].mxu0 }
 0x225   : > { %v392_v42 = vpop.f32.mrb[2].mxu0 }
 0x226   : > { %v396_v43 = vmul.f32 %v390_v40, %v390_v40  ;;  %v393_v44 = vadd.f32 %v571_v38, %v392_v42  ;;  %v600_v45 = vpop.f32.mrb[3].mxu0 }
 0x228   : > { %v398_v46 = vmul.f32 %v396_v43, %v390_v40  ;;  %v397_v47 = vmul.f32 %v393_v44, %v393_v44 }
 0x22a   : > { %v400_v48 = vmul.f32 0.044715, %v398_v46  ;;  %v399_v49 = vmul.f32 %v397_v47, %v393_v44 }
 0x22c   : > { %v402_v50 = vadd.f32 %v400_v48, %v390_v40  ;;  %v401_v51 = vmul.f32 0.044715, %v399_v49 }
 0x22e   : > { %v404_v52 = vmul.f32 0.7978846, %v402_v50  ;;  %v403_v53 = vadd.f32 %v401_v51, %v393_v44 }
 0x230   : > { %633 = vtanh.f32 %v404_v52  ;;  %v405_v54 = vmul.f32 0.7978846, %v403_v53 }
 0x232   : > { %635 = vtanh.f32 %v405_v54 }
 0x23a   : > { %v634_v55 = vpop.eup %633 }
 0x23b   : > { %v408_v56 = vadd.f32 1.0, %v634_v55 }
 0x23c   : > { %v636_v57 = vpop.eup %635 }
 0x23d   : > { %v410_v58 = vmul.f32 0.5, %v408_v56  ;;  %v409_v59 = vadd.f32 1.0, %v636_v57 }
 0x23f   : > { %v411_v60 = vmul.f32 0.5, %v409_v59  ;;  %v412_v61 = vmul.f32 %v410_v58, %v390_v40 }
 0x241   : > { %v413_v62 = vmul.f32 %v411_v60, %v393_v44 }
 0x243   : > { %v414_v63 = vpack.c.bf16 %v413_v62, %v412_v61 }
 0x245   : > { %610 = vmatmul.mubr.msk.bf16.vlgmr.msra.gmra.mrb[0].mxu1 %vm447_vm2, %v414_v63 }
 0x318   : > { %v485_v2 = vpop.f32.mrb[0].mxu1 }
 0x319   : > { %v492_v4 = vadd.f32 %v485_v2, %v703_v0  ;;  %v611_v5 = vpop.f32.mrb[1].mxu1 }
 0x31a   : > { %v488_v6 = vpop.f32.mrb[2].mxu1 }
 0x31b   : > { %v501_v7 = vadd.f32 %v580_v3, %v492_v4  ;;  %v493_v8 = vadd.f32 %v488_v6, %v705_v1  ;;  %v612_v9 = vpop.f32.mrb[3].mxu1 }
 0x31d   : > { %503 = vst.msk [vmem:[%s278_s9] sm:$0xff] %vm284_vm0, %v501_v7  ;;  %v502_v10 = vadd.f32 %v580_v3, %v493_v8 }
 0x31f   : > { %504 = vst.msk [vmem:[%s278_s9 + $0x8] sm:$0xff] %vm284_vm0, %v502_v10 }
 0x320 PF: > { %s17_s24 = sadd.s32 1, %s643_s24  }
 0x321   : > { %p14_p4 = scmp.ge.s32.totalorder %s17_s24, 4  }
 0x323   :  { %16 = sbr.rel (!%p14_p4) target bundleno = 1 (0x1), region = 78 }

// kernel: absolute_cct_forward.17
= control target key start
LH: loop header
LB: loop body
LE: loop exit
PB: predicated region body
PF: predicated region fallthrough
CT: control target
= control target key end

     0   :  { %s985_s0 = inlined_call_operand.vmem [shape: f32[2,16,32], index: 0, kind: input, shape index: {}]   ;;  %s986_s1 = inlined_call_operand.vmem [shape: f32[1,32], index: 1, kind: input, shape index: {}]   ;;  %s987_s2 = inlined_call_operand.vmem [shape: f32[1,32], index: 2, kind: input, shape index: {}]   ;;  %s988_s3 = inlined_call_operand.vmem [shape: f32[1,32], index: 3, kind: input, shape index: {}]   ;;  %s989_s4 = inlined_call_operand.<no memory space> [shape: f32[1,1], index: 4, kind: input, shape index: {}]   ;;  %s990_s5 = inlined_call_operand.vmem [shape: bf16[32,128], index: 5, kind: input, shape index: {}]   ;;  %s991_s6 = inlined_call_operand.vmem [shape: f32[1,128], index: 6, kind: input, shape index: {}]   ;;  %s992_s7 = inlined_call_operand.hbm [shape: f32[2,1,128], index: 7, kind: output, shape index: {}]  }
   0x1   :  { %v12_v0 = vstv %s989_s4 }
   0x2   :  { %13 = vst [vmem:[#allocation2] sm:$0x1] %v12_v0 }
   0x3   :  { %14 = vsyncpa [#allocation4], 0 }
   0x4   :  { %16 = vsyncpa [#allocation4 + $0x1], 0  ;;  %s856_s26 = smov 0   ;;  %s858_s27 = smov 0  }
   0x5   :  { %s860_s28 = smov 0   ;;  %s862_s29 = smov 0  }
   0x6 LB: > { %s877_s4 = sadd.s32 4294967295, %s806_s29   ;;  %s633_s30 = sadd.s32 4294967294, %s806_s29   ;;  %s806_s29 = sphi %s862_s29, %s998_s29   ;;  %s802_s28 = sphi %s860_s28, %s997_s28   ;;  %s798_s27 = sphi %s858_s27, %s996_s27   ;;  %s794_s26 = sphi %s856_s26, %s995_s26  }
   0x7   : > { %s881_s8 = sadd.s32 1, %s806_s29   ;;  %s181_s9 = sadd.s32 1, %s802_s28 }
   0x8   : > { %s178_s10 = ssub.s32 %s806_s29, %s881_s8  ;;  %p191_p0 = scmp.ne.s32.totalorder %s802_s28, %s798_s27 }
   0x9   : > { %p179_p1 = scmp.eq.s32.totalorder %s178_s10, 0  ;;  %p192_p2 = scmp.eq.s32.totalorder %s877_s4, 1 }
   0xa   : > { %p197_p3 = scmp.ne.s32.totalorder %s798_s27, %s794_s26  ;;  %p198_p4 = scmp.eq.s32.totalorder %s633_s30, 1 }
   0xb   : > { %s892_s11 = scalar_select %p179_p1, %s802_s28, %s181_s9  }
   0xc   : > { %p894_p5 = por %p192_p2, %p191_p0  ;;  %p898_p6 = por %p198_p4, %p197_p3 }
   0xd   : > { %p636_p7 = scmp.ge.s32.totalorder %s806_s29, 1  ;;  %p242_p8 = scmp.lt.s32.totalorder %s806_s29, 3 }
   0xf   : > { %p243_p9 = pnand %p636_p7, %p242_p8 }
  0x10   : > { %p273_p10 = scmp.lt.s32.totalorder (!%p243_p9), %s877_s4, 1  ;;  %vm283_vm0 = vcmask (!%p243_p9), 261120   ;;  %v808_v15 = vmov (!%p243_p9), 0.0|0.0   ;;  %vm809_vm1 = vmmov (!%p243_p9), 0   ;;  %v810_v16 = vmov (!%p243_p9), 0.0   ;;  %v734_v51 = vld [vmem:[%s990_s5] sm:$0xff] (!%p243_p9)  }
  0x11   : > { %246 = sbr.rel (%p243_p9) target bundleno = 1325 (0x52d), region = 48  ;;  %683 = vmatprep.subr.bf16.mxu0 (!%p243_p9), %v808_v15  ;;  %665 = vmatprep.mubr.msk.f32.mxu0 (!%p243_p9), %vm809_vm1, %v810_v16  ;;  %v328_v17 = vld [vmem:[#allocation2] sm:$0x1] (!%p243_p9)  ;;  %v811_v18 = vmov (!%p243_p9), 0   ;;  %vm685_vm2 = vmpackc.low (!%p243_p9), %vm283_vm0, %vm283_vm0  ;;  %v334_v37 = vlaneseq (!%p243_p9)  ;;  %vm417_vm3 = vcmask (!%p243_p9), 122880   ;;  %vm429_vm4 = vcmask (!%p243_p9), 130048  }
  0x12   : > { %675 = vmatprep.subr.bf16.mxu1 (!%p243_p9), %v810_v16  ;;  %679 = vmatprep.mubr.msk.bf16.mxu1 (!%p243_p9), %vm809_vm1, %v810_v16  ;;  %v639_v27 = vld [vmem:[%s986_s1] ss:$0 sm:$0xff] (!%p243_p9)  ;;  %v735_v55 = vld [vmem:[%s990_s5 + $0x8] sm:$0xff] (!%p243_p9)   ;;  %s648_s17 = sshll.u32 (!%p243_p9), %s877_s4, 4  ;;  %s812_s24 = smov (!%p243_p9), [#allocation3]  }
  0x13   : > { %733 = vset.pattern.permute.xlu0 (!%p243_p9), %v811_v18  ;;  %v640_v31 = vld [vmem:[%s987_s2] ss:$0 sm:$0xff] (!%p243_p9)  ;;  %v335_v38 = vshrl.u32 (!%p243_p9), %v334_v37, 7  ;;  %676 = vmatpush3.bf16.msra.mxu1 (!%p243_p9), %v734_v51  ;;  %s943_s22 = scalar_lea.hbm (!%p243_p9), %s992_s7, %s648_s17  ;;  %s748_s25 = sshll.u32 (!%p243_p9), %s812_s24, 4  ;;  %s749_s25 = int_to_ptr.vmem [resolvable:$false] %s748_s25 }
  0x14   : > { %v327_v36 = vld [vmem:[%s988_s3] sm:$0x1] (!%p243_p9)  ;;  %677 = vmatprep.subr.bf16.mxu1 (!%p243_p9), %v810_v16  ;;  %s750_s30 = scalar_lea.vmem (!%p243_p9), %s749_s25, 32 }
  0x15   : > { %v336_v39 = vsub.s32 (!%p243_p9), 0, %v335_v38  ;;  %v508_v59 = vld [vmem:[%s991_s6] sm:$0x1] (!%p243_p9) }
  0x17   : > { %678 = vmatpush3.bf16.msra.mxu1 (!%p243_p9), %v735_v55 }
  0x18   : > { %s274_s14 = scalar_select %p273_p10, %s877_s4, 1 }
  0x1a   : > { %s651_s15 = sshll.u32 %s274_s14, 4  ;;  %s271_s14 = sand.u32 1, %s798_s27  }
  0x1b   : > { %s277_s18 = scalar_lea.vmem %s985_s0, %s651_s15  ;;  %s566_s23 = scalar_lea.sflag [#allocation4], %s271_s14 }
  0x1c   : > { %v279_v1 = vld [vmem:[%s277_s18] sm:$0xff]  ;;  %v280_v2 = vld [vmem:[%s277_s18 + $0x8] sm:$0xff]  ;;  %s272_s18 = scalar_lea.vmem [#allocation3], %s271_s14 }
  0x1d   : > { %v284_v3 = vsel %vm283_vm0, %v279_v1, 0.0  ;;  %v287_v4 = vsel %vm283_vm0, %v280_v2, 0.0  ;;  %s578_s19 = sshll.u32 %s272_s18, 4  ;;  %s945_s19 = int_to_ptr.vmem [resolvable:$true] %s578_s19 }
  0x1e   : > { %285 = vadd.xlane.f32.xlu0 %v284_v3  ;;  %s744_s4 = scalar_lea.vmem %s945_s19, 16  ;;  %p751_p0 = scmp.lt.s32.totalorder %s945_s19, %s749_s25 }
  0x1f   : > { %p745_p11 = scmp.ne.s32.totalorder %s945_s19, %s744_s4  ;;  %p752_p1 = scmp.lt.s32.totalorder %s750_s30, %s744_s4 }
  0x21   : > { %p746_p12 = pnand %p745_p11, %p894_p5  ;;  %p753_p2 = por %p752_p1, %p751_p0 }
  0x22   : > { %288 = vadd.xlane.f32.xlu0 %v287_v4 }
  0x23   : > { %p747_p13 = pneg %p746_p12 }
  0x25   : > { %p754_p3 = pnand %p753_p2, %p747_p13 }
  0x38   : > { %331 = vperm.xlu0 %733, %v328_v17  }
  0xab   : > { %v286_v5 = vpop.xlane.xlu0 %285 }
  0xac   : > { %v291_v6 = vmul.f32 0.03125, %v286_v5 }
  0xae   : > { %v293_v7 = vsub.f32 %v279_v1, %v291_v6 }
  0xaf   : > { %v289_v8 = vpop.xlane.xlu0 %288 }
  0xb0   : > { %v292_v9 = vmul.f32 0.03125, %v289_v8  ;;  %v295_v10 = vmul.f32 %v293_v7, %v293_v7 }
  0xb2   : > { %v294_v11 = vsub.f32 %v280_v2, %v292_v9  ;;  %v297_v12 = vsel %vm283_vm0, %v295_v10, 0.0 }
  0xb3   : > { %298 = vadd.xlane.f32.xlu1 %v297_v12 }
  0xb4   : > { %v296_v13 = vmul.f32 %v294_v11, %v294_v11 }
  0xb6   : > { %v300_v14 = vsel %vm283_vm0, %v296_v13, 0.0 }
  0xb7   : > { %301 = vadd.xlane.f32.xlu1 %v300_v14  ;;  %v332_v40 = vpop.permute.xlu0 %331 }
  0xb8   : > { %v337_v41 = vrot.slane %v332_v40, %v336_v39 }
 0x140   : > { %v299_v19 = vpop.xlane.xlu1 %298 }
 0x141   : > { %v303_v20 = vmul.f32 0.03125, %v299_v19 }
 0x143   : > { %v305_v21 = vadd.f32 1e-05, %v303_v20 }
 0x144   : > { %v302_v22 = vpop.xlane.xlu1 %301 }
 0x145   : > { %736 = vrsqrt.f32 %v305_v21  ;;  %v304_v23 = vmul.f32 0.03125, %v302_v22 }
 0x147   : > { %v306_v24 = vadd.f32 1e-05, %v304_v23 }
 0x149   : > { %738 = vrsqrt.f32 %v306_v24 }
 0x14f   : > { %v737_v25 = vpop.eup %736 }
 0x150   : > { %v309_v26 = vmul.f32 %v737_v25, %v293_v7 }
 0x152   : > { %v317_v30 = vmul.f32 %v639_v27, %v309_v26 }
 0x153   : > { %v739_v28 = vpop.eup %738 }
 0x154   : > { %v310_v29 = vmul.f32 %v739_v28, %v294_v11  ;;  %v325_v33 = vadd.f32 %v640_v31, %v317_v30 }
 0x156   : > { %v318_v32 = vmul.f32 %v639_v27, %v310_v29 }
 0x158   : > { %v326_v34 = vadd.f32 %v640_v31, %v318_v32 }
 0x15a   : > { %v684_v35 = vpack.c.bf16 %v326_v34, %v325_v33 }
 0x15c   : > { %686 = vmatpush3.bf16.xpose.msk.msra.mxu0 %vm685_vm2, %v684_v35 }
 0x15d   : > { %687 = vmatprep.subr.bf16.mxu0 %v808_v15 }
 0x163   : > { %666 = vmatmul.mubr.msk.f32.vlgmr.msra.gmra.mrb[0].mxu0 %vm283_vm0, %v327_v36 }
 0x164   : > { %689 = vmatpush3.bf16.msra.mxu0 %v684_v35  ;;  %672 = vmatprep.mubr.msk.f32.mxu0 %vm809_vm1, %v810_v16 }
 0x236   : > { %v413_v42 = vpop.f32.mrb[0].mxu0 }
 0x237   : > { %v414_v43 = vadd.f32 %v413_v42, %v337_v41  ;;  %v667_v44 = vpop.f32.mrb[1].mxu0 }
 0x239   : > { %v418_v45 = vsel %vm417_vm3, %v414_v43, -inf }
 0x23a   : > { %419 = vmax.xlane.f32.xlu1 %v418_v45 }
 0x2c7   : > { %v420_v46 = vpop.xlane.xlu1 %419 }
 0x2c8   : > { %v421_v47 = vsub.f32 %v414_v43, %v420_v46 }
 0x2ca   : > { %v422_v48 = vmul.f32 1.442695, %v421_v47 }
 0x2cc   : > { %740 = vpow2.f32 %v422_v48 }
 0x2d6   : > { %v741_v49 = vpop.eup %740 }
 0x2d7   : > { %v424_v50 = vsel %vm417_vm3, %v741_v49, 0.0 }
 0x2d8   : > { %425 = vadd.xlane.f32.xlu1 %v424_v50 }
 0x365   : > { %v426_v52 = vpop.xlane.xlu1 %425 }
 0x366   : > { %742 = vrcp.f32 %v426_v52 }
 0x370   : > { %v743_v53 = vpop.eup %742 }
 0x371   : > { %v428_v54 = vmul.f32 %v743_v53, %v741_v49 }
 0x373   : > { %673 = vmatmul.mubr.msk.f32.vlgmr.msra.gmra.mrb[2].mxu0 %vm429_vm4, %v428_v54 }
 0x446   : > { %v499_v56 = vpop.f32.mrb[2].mxu0 }
 0x447   : > { %v503_v57 = vpack.c.bf16 %v499_v56, %v499_v56  ;;  %v674_v58 = vpop.f32.mrb[3].mxu0 }
 0x449   : > { %680 = vmatmul.mubr.msk.bf16.vlgmr.msra.gmra.mrb[0].mxu1 %vm283_vm0, %v503_v57 }
 0x51c   : > { %v558_v60 = vpop.f32.mrb[0].mxu1 }
 0x51d   : > { %v559_v61 = vadd.f32 %v558_v60, %v508_v59  ;;  %v681_v62 = vpop.f32.mrb[1].mxu1 }
 0x51e   : > { %v561_v63 = vpop.f32.mrb[2].mxu1 }
 0x51f   : > { %564 = vst [vmem:[%s272_s18] sm:$0x1] %v559_v61  ;;  %v682_v0 = vpop.f32.mrb[3].mxu1 }
 0x520   : > { %757 = shalt.err (!%p754_p3)
}
 0x521   : > { %s758_s9 = scalar_lea.hbm %s943_s22, 16  ;;  %s762_s15 = scalar_lea.hbm %s992_s7, 32 }
 0x522   : > { %p759_p4 = scmp.ne.s32.totalorder %s943_s22, %s758_s9  ;;  %p763_p9 = scmp.lt.u32.totalorder %s943_s22, %s992_s7 }
 0x523   : > { %p764_p10 = scmp.lt.u32.totalorder %s762_s15, %s758_s9  ;;  %p766_p12 = scmp.lt.u32.totalorder %s758_s9, %s943_s22 }
 0x524   : > { %p760_p7 = pnand %p759_p4, %p894_p5 }
 0x525   : > { %p765_p11 = por %p764_p10, %p763_p9 }
 0x526   : > { %p761_p8 = pneg %p760_p7 }
 0x527   : > { %p767_p13 = por %p766_p12, %p765_p11 }
 0x529   : > { %p768_p0 = pnand %p767_p13, %p761_p8 }
 0x52b   : > { %771 = shalt.err (!%p768_p0)
}
 0x52c   : > { %690 = dma.vmem_to_hbm [thread:$0]  (%p894_p5), %s945_s19, 16, %s943_s22, %s566_s23  }
 0x52d PF: > { %p696_p1 = scmp.ge.s32.totalorder %s806_s29, 2  ;;  %s590_s18 = sand.u32 1, %s794_s26  }
 0x52e   : > { %s591_s20 = scalar_lea.sflag [#allocation4], %s590_s18 }
 0x52f   : > { %p693_p2 = pnand %p696_p1, %p898_p6 }
 0x531   : > { %789 = dma.done.wait (!%p693_p2), %s591_s20, 16  }
 0x532   : > { %791 = vsyncadd (!%p693_p2), %s591_s20, 4294967280  ;;  %p19_p3 = scmp.ge.s32.totalorder %s881_s8, 4   ;;  %s995_s26 = smov %s798_s27 }
 0x533   : > { %s996_s27 = smov %s802_s28  ;;  %s997_s28 = smov %s892_s11 }
 0x534   : > { %s998_s29 = smov %s881_s8  ;;  %21 = sbr.rel (!%p19_p3) target bundleno = 6 (0x6), region = 83 }
 0x53b   :  { %595 = vsyncpa [#allocation4], 1 }
 0x53c   :  { %597 = vsyncpa [#allocation4 + $0x1], 1 }

</bundles_post_ra>
